<compile_context>
chip_gen: v6e
topology: v6e:2x2x1
jax: 0.10.0
libtpu: 0.0.40
codegen_flags: <defaults>
</compile_context>

<pallas_src>
import jax
import jax.numpy as jnp
from jax.experimental import pallas as pl
from jax.experimental.pallas import tpu as pltpu

# ----------------------- small, ViT-consistent config -----------------------
B, C, H, W = 2, 3, 16, 16
PATCH = 8                       # stride == patch (non-overlapping patch embed)
EMBED = 64                      # stand-in for in_planes=768
HEADS = 2
HEAD_DIM = EMBED // HEADS
MLP_DIM = 4 * EMBED
DEPTH = 2
NUM_CLASSES = 16
GH, GW = H // PATCH, W // PATCH
NPATCH = GH * GW
NTOK = NPATCH + 1               # +1 CLS token
T_PAD = 8                       # tokens per image, padded to a sublane multiple
NROWS = B * T_PAD               # activation rows (multiple of 8)
PATCH_K = C * PATCH * PATCH
LN_EPS = 1e-6
BN_EPS = 1e-5
SCALE = HEAD_DIM ** -0.5
NEG_INF = -1e30

# Row layout of the resident activation slab: row r = b*T_PAD + t, where t=0 is
# the CLS token of image b, t in [1, NTOK) are its patch tokens, and
# t in [NTOK, T_PAD) are zero padding rows (masked out as attention keys).


# ------------------------- fused whole-forward kernel ------------------------
def _vit_fused_kernel(
    patches_hbm, pe_w_hbm, x0_bias_hbm,
    ln1g_ref, ln1b_ref, wqkv_ref, bqkv_ref, wproj_ref, bproj_ref,
    ln2g_ref, ln2b_ref, w1_ref, b1_ref, w2_ref, b2_ref,
    norm_g_ref, norm_b_ref, bn_g_ref, bn_b_ref, wc_ref,
    gf_ref, cs_ref, x_ref):
    D = EMBED
    d = pl.program_id(0)

    # ---- prolog (depth step 0): patch embed + CLS + positional embedding ----
    # Prolog-only operands live in HBM (pl.ANY) and are DMA'd into short-lived
    # run_scoped VMEM buffers instead of pinning whole-grid-resident VMEM.
    @pl.when(d == 0)
    def _():
        def prolog(pbuf, wbuf, bbuf, sem):
            cps = (pltpu.make_async_copy(patches_hbm, pbuf, sem.at[0]),
                   pltpu.make_async_copy(pe_w_hbm, wbuf, sem.at[1]),
                   pltpu.make_async_copy(x0_bias_hbm, bbuf, sem.at[2]))
            for cp in cps:
                cp.start()
            for cp in cps:
                cp.wait()
            tok = jnp.dot(pbuf[...], wbuf[...],
                          preferred_element_type=jnp.float32)   # (NROWS, D)
            # CLS / padding rows of `patches` are zero, so a single full-slab
            # aligned store covers every row.
            x_ref[...] = bbuf[...] + tok

        pl.run_scoped(prolog,
                      pltpu.VMEM((NROWS, PATCH_K), jnp.bfloat16),
                      pltpu.VMEM((PATCH_K, D), jnp.bfloat16),
                      pltpu.VMEM((NROWS, D), jnp.float32),
                      pltpu.SemaphoreType.DMA((3,)))

    # ---- transformer block d (activation slab resident in VMEM scratch) -----
    x = x_ref[...]                                              # (NROWS, D) f32

    # LayerNorm 1 (f32 elementwise math on all generations).
    mu = jnp.mean(x, axis=-1, keepdims=True)
    var = jnp.mean((x - mu) ** 2, axis=-1, keepdims=True)
    h = (x - mu) * jax.lax.rsqrt(var + LN_EPS) * ln1g_ref[0] + ln1b_ref[0]

    # Fused QKV projection: ONE (NROWS, D) x (D, 3D) MXU matmul.  The attention
    # scale was pre-folded into the Q columns host-side.
    qkv = jnp.dot(h.astype(jnp.bfloat16), wqkv_ref[0],
                  preferred_element_type=jnp.float32) + bqkv_ref[0]
    q = qkv[:, 0:D].reshape(B, T_PAD, D)
    k = qkv[:, D:2 * D].reshape(B, T_PAD, D)
    v = qkv[:, 2 * D:3 * D].reshape(B, T_PAD, D)

    # Per-image attention (no (B*NTOK)^2 score matrix).  The only masking is
    # for the padded key slots; generated in-kernel, nothing DMA'd from HBM.
    key_idx = jax.lax.broadcasted_iota(jnp.int32, (T_PAD, T_PAD), 1)
    kmask = jnp.where(key_idx < NTOK, 0.0, NEG_INF).astype(jnp.float32)
    ctx_heads = []
    for hh in range(HEADS):          # head loop covers only the softmax core;
        lo = hh * HEAD_DIM           # all projections are fused matmuls.
        s = jnp.einsum('bqd,bkd->bqk',
                       q[:, :, lo:lo + HEAD_DIM], k[:, :, lo:lo + HEAD_DIM],
                       preferred_element_type=jnp.float32) + kmask
        s = s - jnp.max(s, axis=-1, keepdims=True)
        p = jnp.exp(s)
        p = p * pl.reciprocal(jnp.sum(p, axis=-1, keepdims=True), approx=True)
        ctx_heads.append(
            jnp.einsum('bqk,bkd->bqd', p, v[:, :, lo:lo + HEAD_DIM],
                       preferred_element_type=jnp.float32))
    # Head outputs laid lane-contiguously, then ONE (NROWS, D) x (D, D) output
    # projection.
    ctx = jnp.concatenate(ctx_heads, axis=-1).reshape(NROWS, D)
    attn = jnp.dot(ctx.astype(jnp.bfloat16), wproj_ref[0],
                   preferred_element_type=jnp.float32) + bproj_ref[0]
    x = x + attn                                                # residual

    # LayerNorm 2 + MLP.
    mu2 = jnp.mean(x, axis=-1, keepdims=True)
    var2 = jnp.mean((x - mu2) ** 2, axis=-1, keepdims=True)
    h2 = (x - mu2) * jax.lax.rsqrt(var2 + LN_EPS) * ln2g_ref[0] + ln2b_ref[0]
    h2 = jnp.dot(h2.astype(jnp.bfloat16), w1_ref[0],
                 preferred_element_type=jnp.float32) + b1_ref[0]
    # TODO(synk): timm uses exact (erf) GELU; tanh approximation used here.
    h2 = jax.nn.gelu(h2, approximate=True)
    h2 = jnp.dot(h2.astype(jnp.bfloat16), w2_ref[0],
                 preferred_element_type=jnp.float32) + b2_ref[0]
    x_out = x + h2                                              # residual
    x_ref[...] = x_out

    # ---- epilog (last step): final LN on CLS rows + BN bottleneck + classifier
    @pl.when(d == pl.num_programs(0) - 1)
    def _():
        g = x_out.reshape(B, T_PAD, D)[:, 0, :]                 # CLS rows (B, D)
        gmu = jnp.mean(g, axis=-1, keepdims=True)
        gvar = jnp.mean((g - gmu) ** 2, axis=-1, keepdims=True)
        gf = ((g - gmu) * jax.lax.rsqrt(gvar + LN_EPS)
              * norm_g_ref[...] + norm_b_ref[...])
        gf_ref[...] = gf                                        # global_feat
        # BatchNorm1d bottleneck (training mode: biased batch statistics).
        bm = jnp.mean(gf, axis=0, keepdims=True)
        bv = jnp.mean((gf - bm) ** 2, axis=0, keepdims=True)
        feat = ((gf - bm) * jax.lax.rsqrt(bv + BN_EPS)
                * bn_g_ref[...] + bn_b_ref[...])
        # classifier: Linear(in_planes, num_classes, bias=False)
        cs_ref[...] = jnp.dot(feat.astype(jnp.bfloat16), wc_ref[...],
                              preferred_element_type=jnp.float32)


# ------------------------------ pallas_call setup -----------------------------
def _const_spec(shape):
    n = len(shape)
    return pl.BlockSpec(shape, lambda d: (0,) * n)


def _depth_spec(shape):
    n = len(shape)
    return pl.BlockSpec(shape, lambda d: (d,) + (0,) * (n - 1))


def vit_fused_forward(patches, flat):
    D, Dm, NC = EMBED, MLP_DIM, NUM_CLASSES
    gf, cs = pl.pallas_call(
        _vit_fused_kernel,
        out_shape=(jax.ShapeDtypeStruct((B, D), jnp.float32),    # global_feat
                   jax.ShapeDtypeStruct((B, NC), jnp.float32)),  # cls_score
        grid=(DEPTH,),
        in_specs=[
            pl.BlockSpec(memory_space=pl.ANY),   # patches   (prolog only, bf16)
            pl.BlockSpec(memory_space=pl.ANY),   # pe_w      (prolog only, bf16)
            pl.BlockSpec(memory_space=pl.ANY),   # x0_bias   (prolog only, f32)
            _depth_spec((1, 1, D)),              # ln1 gamma
            _depth_spec((1, 1, D)),              # ln1 beta
            _depth_spec((1, D, 3 * D)),          # fused qkv weight (bf16)
            _depth_spec((1, 1, 3 * D)),          # fused qkv bias
            _depth_spec((1, D, D)),              # attn out-proj weight (bf16)
            _depth_spec((1, 1, D)),              # attn out-proj bias
            _depth_spec((1, 1, D)),              # ln2 gamma
            _depth_spec((1, 1, D)),              # ln2 beta
            _depth_spec((1, D, Dm)),             # mlp w1 (bf16)
            _depth_spec((1, 1, Dm)),             # mlp b1
            _depth_spec((1, Dm, D)),             # mlp w2 (bf16)
            _depth_spec((1, 1, D)),              # mlp b2
            _const_spec((1, D)),                 # final norm gamma
            _const_spec((1, D)),                 # final norm beta
            _const_spec((1, D)),                 # BN gamma
            _const_spec((1, D)),                 # BN beta
            _const_spec((D, NC)),                # classifier weight (bf16)
        ],
        out_specs=(pl.BlockSpec((B, D), lambda d: (0, 0)),
                   pl.BlockSpec((B, NC), lambda d: (0, 0))),
        scratch_shapes=[pltpu.VMEM((NROWS, D), jnp.float32)],   # resident slab
        compiler_params=pltpu.CompilerParams(
            dimension_semantics=("arbitrary",),   # depth is sequential
            vmem_limit_bytes=48 * 1024 * 1024),
    )(patches, flat["pe_w"], flat["x0_bias"],
      flat["ln1g"], flat["ln1b"], flat["wqkv"], flat["bqkv"],
      flat["wproj"], flat["bproj"], flat["ln2g"], flat["ln2b"],
      flat["w1"], flat["b1"], flat["w2"], flat["b2"],
      flat["norm_g"], flat["norm_b"], flat["bn_g"], flat["bn_b"], flat["wc"])
    return cs, gf


# -------------------------- deterministic parameters -------------------------
def init_params(key):
    ks = iter(jax.random.split(key, 8 + DEPTH * 4))
    nrm = lambda k, shape, std=0.02: jax.random.normal(k, shape, jnp.float32) * std
    D, Dm = EMBED, MLP_DIM
    params = {
        "pe_w": nrm(next(ks), (PATCH_K, D)),
        "pe_b": jnp.zeros((1, D), jnp.float32),
        "cls_token": nrm(next(ks), (1, 1, D)),
        "pos_embed": nrm(next(ks), (1, NTOK, D)),
        "norm_g": jnp.ones((1, D), jnp.float32),
        "norm_b": jnp.zeros((1, D), jnp.float32),
        "bn_g": jnp.ones((1, D), jnp.float32),      # weights_init_kaiming: gamma=1
        "bn_b": jnp.zeros((1, D), jnp.float32),     # beta=0 (requires_grad False)
        "wc": nrm(next(ks), (D, NUM_CLASSES), std=0.001),  # weights_init_classifier
        "blocks": [],
    }
    for _ in range(DEPTH):
        params["blocks"].append({
            "ln1g": jnp.ones((1, D), jnp.float32),
            "ln1b": jnp.zeros((1, D), jnp.float32),
            "wqkv": nrm(next(ks), (D, 3 * D)),      # columns ordered q | k | v
            "bqkv": jnp.zeros((1, 3 * D), jnp.float32),
            "wproj": nrm(next(ks), (D, D)),
            "bproj": jnp.zeros((1, D), jnp.float32),
            "ln2g": jnp.ones((1, D), jnp.float32),
            "ln2b": jnp.zeros((1, D), jnp.float32),
            "w1": nrm(next(ks), (D, Dm)),
            "b1": jnp.zeros((1, Dm), jnp.float32),
            "w2": nrm(next(ks), (Dm, D)),
            "b2": jnp.zeros((1, D), jnp.float32),
        })
    return params


def prepare_params(params):
    """Parameter-only prep (one time, no activation data): stack per-block
    weights along a depth axis, fold the attention scale into the Q projection,
    store matmul weights in bf16, and fold cls token / positional embedding /
    patch bias into one initial-slab additive bias."""
    D = EMBED
    blocks = params["blocks"]
    st = lambda key: jnp.stack([blk[key] for blk in blocks], axis=0)

    # Fold the attention scale into the Q columns (free, parameter-only).
    scale_vec = jnp.concatenate(
        [jnp.full((D,), SCALE, jnp.float32), jnp.ones((2 * D,), jnp.float32)])
    wqkv = (st("wqkv") * scale_vec).astype(jnp.bfloat16)   # (L, D, 3D)
    bqkv = st("bqkv") * scale_vec                          # (L, 1, 3D) f32

    # Initial slab bias: row t=0 -> cls + pos[0]; rows 1..NTOK-1 -> pe_b + pos;
    # rows NTOK..T_PAD-1 -> zero padding (masked out as attention keys).
    pos = params["pos_embed"][0]                           # (NTOK, D)
    x0 = jnp.zeros((B, T_PAD, D), jnp.float32)
    x0 = x0.at[:, 0, :].set(params["cls_token"][0, 0] + pos[0])
    x0 = x0.at[:, 1:NTOK, :].set(params["pe_b"] + pos[1:NTOK])

    return {
        "pe_w": params["pe_w"].astype(jnp.bfloat16),
        "x0_bias": x0.reshape(NROWS, D),
        "ln1g": st("ln1g"), "ln1b": st("ln1b"),
        "wqkv": wqkv, "bqkv": bqkv,
        "wproj": st("wproj").astype(jnp.bfloat16), "bproj": st("bproj"),
        "ln2g": st("ln2g"), "ln2b": st("ln2b"),
        "w1": st("w1").astype(jnp.bfloat16), "b1": st("b1"),
        "w2": st("w2").astype(jnp.bfloat16), "b2": st("b2"),
        "norm_g": params["norm_g"], "norm_b": params["norm_b"],
        "bn_g": params["bn_g"], "bn_b": params["bn_b"],
        "wc": params["wc"].astype(jnp.bfloat16),
    }


# --------------------------------- forward -----------------------------------
def build_vit_forward(x, params, flat=None):
    """x: (B, C, H, W) NCHW float32. Returns (cls_score, global_feat)."""
    if flat is None:
        flat = prepare_params(params)
    # Non-overlapping patch extraction (== Conv2d with kernel=stride=PATCH),
    # padded to T_PAD token rows per image (CLS / padding rows are zero so the
    # in-kernel patch-embed matmul leaves them untouched).
    p = (x.reshape(B, C, GH, PATCH, GW, PATCH)
          .transpose(0, 2, 4, 1, 3, 5)
          .reshape(B, NPATCH, PATCH_K))
    patches = jnp.zeros((B, T_PAD, PATCH_K), jnp.float32)
    patches = patches.at[:, 1:NTOK, :].set(p)
    patches = patches.reshape(NROWS, PATCH_K).astype(jnp.bfloat16)
    # TODO(synk): dropout / drop-path omitted (rates are 0 in the reference config).
    return vit_fused_forward(patches, flat)


if __name__ == "__main__":
    key = jax.random.PRNGKey(0)
    k_param, k_x = jax.random.split(key)
    params = init_params(k_param)
    flat = prepare_params(params)
    x = jax.random.normal(k_x, (B, C, H, W), jnp.float32)

    cls_score, global_feat = build_vit_forward(x, params, flat)
    jax.block_until_ready((cls_score, global_feat))

    assert cls_score.shape == (B, NUM_CLASSES)
    assert global_feat.shape == (B, EMBED)
    assert bool(jnp.all(jnp.isfinite(cls_score)))
    assert bool(jnp.all(jnp.isfinite(global_feat)))
    print("KERNEL_OK")
</pallas_src>

<mosaic_0001>
module attributes {stable_mosaic.version = 11 : i64} {
  func.func @_vit_fused_kernel(%arg0: i32, %arg1: memref<16x192xbf16, #tpu.memory_space<any>>, %arg2: memref<192x64xbf16, #tpu.memory_space<any>>, %arg3: memref<16x64xf32, #tpu.memory_space<any>>, %arg4: memref<1x1x64xf32, #tpu.memory_space<vmem>>, %arg5: memref<1x1x64xf32, #tpu.memory_space<vmem>>, %arg6: memref<1x64x192xbf16, #tpu.memory_space<vmem>>, %arg7: memref<1x1x192xf32, #tpu.memory_space<vmem>>, %arg8: memref<1x64x64xbf16, #tpu.memory_space<vmem>>, %arg9: memref<1x1x64xf32, #tpu.memory_space<vmem>>, %arg10: memref<1x1x64xf32, #tpu.memory_space<vmem>>, %arg11: memref<1x1x64xf32, #tpu.memory_space<vmem>>, %arg12: memref<1x64x256xbf16, #tpu.memory_space<vmem>>, %arg13: memref<1x1x256xf32, #tpu.memory_space<vmem>>, %arg14: memref<1x256x64xbf16, #tpu.memory_space<vmem>>, %arg15: memref<1x1x64xf32, #tpu.memory_space<vmem>>, %arg16: memref<1x64xf32, #tpu.memory_space<vmem>>, %arg17: memref<1x64xf32, #tpu.memory_space<vmem>>, %arg18: memref<1x64xf32, #tpu.memory_space<vmem>>, %arg19: memref<1x64xf32, #tpu.memory_space<vmem>>, %arg20: memref<64x16xbf16, #tpu.memory_space<vmem>>, %arg21: memref<2x64xf32, #tpu.memory_space<vmem>>, %arg22: memref<2x16xf32, #tpu.memory_space<vmem>>, %arg23: memref<16x64xf32, #tpu.memory_space<vmem>>) attributes {dimension_semantics = [#tpu.dimension_semantics<arbitrary>], iteration_bounds = array<i64: 2>, scalar_prefetch = 0 : i64, scratch_operands = 1 : i64, tpu.core_type = #tpu.core_type<tc>, window_params = [{}, {}, {}, {transform_indices = @transform_3, window_bounds = array<i64: 1, 1, 64>}, {transform_indices = @transform_4, window_bounds = array<i64: 1, 1, 64>}, {transform_indices = @transform_5, window_bounds = array<i64: 1, 64, 192>}, {transform_indices = @transform_6, window_bounds = array<i64: 1, 1, 192>}, {transform_indices = @transform_7, window_bounds = array<i64: 1, 64, 64>}, {transform_indices = @transform_8, window_bounds = array<i64: 1, 1, 64>}, {transform_indices = @transform_9, window_bounds = array<i64: 1, 1, 64>}, {transform_indices = @transform_10, window_bounds = array<i64: 1, 1, 64>}, {transform_indices = @transform_11, window_bounds = array<i64: 1, 64, 256>}, {transform_indices = @transform_12, window_bounds = array<i64: 1, 1, 256>}, {transform_indices = @transform_13, window_bounds = array<i64: 1, 256, 64>}, {transform_indices = @transform_14, window_bounds = array<i64: 1, 1, 64>}, {pipeline_mode = #tpu.pipeline_mode<synchronous>, transform_indices = @transform_15, window_bounds = array<i64: 1, 64>}, {pipeline_mode = #tpu.pipeline_mode<synchronous>, transform_indices = @transform_16, window_bounds = array<i64: 1, 64>}, {pipeline_mode = #tpu.pipeline_mode<synchronous>, transform_indices = @transform_17, window_bounds = array<i64: 1, 64>}, {pipeline_mode = #tpu.pipeline_mode<synchronous>, transform_indices = @transform_18, window_bounds = array<i64: 1, 64>}, {pipeline_mode = #tpu.pipeline_mode<synchronous>, transform_indices = @transform_19, window_bounds = array<i64: 64, 16>}, {pipeline_mode = #tpu.pipeline_mode<synchronous>, transform_indices = @transform_20, window_bounds = array<i64: 2, 64>}, {pipeline_mode = #tpu.pipeline_mode<synchronous>, transform_indices = @transform_21, window_bounds = array<i64: 2, 16>}]} {
    %c0_i32 = arith.constant 0 : i32
    %0 = arith.cmpi eq, %arg0, %c0_i32 : i32
    %1 = arith.extui %0 : i1 to i32
    %c0_i32_0 = arith.constant 0 : i32
    %2 = arith.cmpi ne, %1, %c0_i32_0 : i32
    scf.if %2 {
      "tpu.region"() ({
        %alloca = memref.alloca() : memref<16x192xbf16, #tpu.memory_space<vmem>>
        %alloca_68 = memref.alloca() : memref<192x64xbf16, #tpu.memory_space<vmem>>
        %alloca_69 = memref.alloca() : memref<16x64xf32, #tpu.memory_space<vmem>>
        %157 = tpu.sem_alloc : memref<3x!tpu.dma_semaphore, #tpu.memory_space<semaphore_mem>>
        %c0_i32_70 = arith.constant 0 : i32
        %158 = tpu.memref_slice %157[%c0_i32_70] : memref<3x!tpu.dma_semaphore, #tpu.memory_space<semaphore_mem>> -> memref<1x!tpu.dma_semaphore, #tpu.memory_space<semaphore_mem>>
        %159 = tpu.memref_squeeze %158 : memref<1x!tpu.dma_semaphore, #tpu.memory_space<semaphore_mem>> -> memref<!tpu.dma_semaphore, #tpu.memory_space<semaphore_mem>>
        tpu.enqueue_dma source(%arg1 : memref<16x192xbf16, #tpu.memory_space<any>>) target(%alloca : memref<16x192xbf16, #tpu.memory_space<vmem>>) target_semaphore(%159 : memref<!tpu.dma_semaphore, #tpu.memory_space<semaphore_mem>>)
        %c1_i32_71 = arith.constant 1 : i32
        %160 = tpu.memref_slice %157[%c1_i32_71] : memref<3x!tpu.dma_semaphore, #tpu.memory_space<semaphore_mem>> -> memref<1x!tpu.dma_semaphore, #tpu.memory_space<semaphore_mem>>
        %161 = tpu.memref_squeeze %160 : memref<1x!tpu.dma_semaphore, #tpu.memory_space<semaphore_mem>> -> memref<!tpu.dma_semaphore, #tpu.memory_space<semaphore_mem>>
        tpu.enqueue_dma source(%arg2 : memref<192x64xbf16, #tpu.memory_space<any>>) target(%alloca_68 : memref<192x64xbf16, #tpu.memory_space<vmem>>) target_semaphore(%161 : memref<!tpu.dma_semaphore, #tpu.memory_space<semaphore_mem>>)
        %c2_i32 = arith.constant 2 : i32
        %162 = tpu.memref_slice %157[%c2_i32] : memref<3x!tpu.dma_semaphore, #tpu.memory_space<semaphore_mem>> -> memref<1x!tpu.dma_semaphore, #tpu.memory_space<semaphore_mem>>
        %163 = tpu.memref_squeeze %162 : memref<1x!tpu.dma_semaphore, #tpu.memory_space<semaphore_mem>> -> memref<!tpu.dma_semaphore, #tpu.memory_space<semaphore_mem>>
        tpu.enqueue_dma source(%arg3 : memref<16x64xf32, #tpu.memory_space<any>>) target(%alloca_69 : memref<16x64xf32, #tpu.memory_space<vmem>>) target_semaphore(%163 : memref<!tpu.dma_semaphore, #tpu.memory_space<semaphore_mem>>)
        %c0_i32_72 = arith.constant 0 : i32
        %164 = tpu.memref_slice %157[%c0_i32_72] : memref<3x!tpu.dma_semaphore, #tpu.memory_space<semaphore_mem>> -> memref<1x!tpu.dma_semaphore, #tpu.memory_space<semaphore_mem>>
        %165 = tpu.memref_squeeze %164 : memref<1x!tpu.dma_semaphore, #tpu.memory_space<semaphore_mem>> -> memref<!tpu.dma_semaphore, #tpu.memory_space<semaphore_mem>>
        tpu.wait_dma2 semaphore(%165 : memref<!tpu.dma_semaphore, #tpu.memory_space<semaphore_mem>>) src(%arg1 : memref<16x192xbf16, #tpu.memory_space<any>>) dst(%alloca : memref<16x192xbf16, #tpu.memory_space<vmem>>)
        %c1_i32_73 = arith.constant 1 : i32
        %166 = tpu.memref_slice %157[%c1_i32_73] : memref<3x!tpu.dma_semaphore, #tpu.memory_space<semaphore_mem>> -> memref<1x!tpu.dma_semaphore, #tpu.memory_space<semaphore_mem>>
        %167 = tpu.memref_squeeze %166 : memref<1x!tpu.dma_semaphore, #tpu.memory_space<semaphore_mem>> -> memref<!tpu.dma_semaphore, #tpu.memory_space<semaphore_mem>>
        tpu.wait_dma2 semaphore(%167 : memref<!tpu.dma_semaphore, #tpu.memory_space<semaphore_mem>>) src(%arg2 : memref<192x64xbf16, #tpu.memory_space<any>>) dst(%alloca_68 : memref<192x64xbf16, #tpu.memory_space<vmem>>)
        %c2_i32_74 = arith.constant 2 : i32
        %168 = tpu.memref_slice %157[%c2_i32_74] : memref<3x!tpu.dma_semaphore, #tpu.memory_space<semaphore_mem>> -> memref<1x!tpu.dma_semaphore, #tpu.memory_space<semaphore_mem>>
        %169 = tpu.memref_squeeze %168 : memref<1x!tpu.dma_semaphore, #tpu.memory_space<semaphore_mem>> -> memref<!tpu.dma_semaphore, #tpu.memory_space<semaphore_mem>>
        tpu.wait_dma2 semaphore(%169 : memref<!tpu.dma_semaphore, #tpu.memory_space<semaphore_mem>>) src(%arg3 : memref<16x64xf32, #tpu.memory_space<any>>) dst(%alloca_69 : memref<16x64xf32, #tpu.memory_space<vmem>>)
        %c0_75 = arith.constant 0 : index
        %c0_76 = arith.constant 0 : index
        %170 = vector.load %alloca[%c0_75, %c0_76] : memref<16x192xbf16, #tpu.memory_space<vmem>>, vector<16x192xbf16>
        %c0_77 = arith.constant 0 : index
        %c0_78 = arith.constant 0 : index
        %171 = vector.load %alloca_68[%c0_77, %c0_78] : memref<192x64xbf16, #tpu.memory_space<vmem>>, vector<192x64xbf16>
        %cst_79 = arith.constant dense<0.000000e+00> : vector<16x64xf32>
        %172 = tpu.matmul %170, %171, %cst_79 {dimension_numbers = #tpu.dot_dimension_numbers<[1], [0], [0], [1], [0, 0, 1, 1], [], []>} : vector<16x192xbf16>, vector<192x64xbf16>, vector<16x64xf32> -> vector<16x64xf32>
        %c0_80 = arith.constant 0 : index
        %c0_81 = arith.constant 0 : index
        %173 = vector.load %alloca_69[%c0_80, %c0_81] : memref<16x64xf32, #tpu.memory_space<vmem>>, vector<16x64xf32>
        %174 = arith.addf %173, %172 : vector<16x64xf32>
        %c0_82 = arith.constant 0 : index
        %c0_83 = arith.constant 0 : index
        %175 = vector.load %arg23[%c0_82, %c0_83] : memref<16x64xf32, #tpu.memory_space<vmem>>, vector<16x64xf32>
        tpu.vector_store %arg23[%c0_82, %c0_83], %174 {strides = array<i32>} : memref<16x64xf32, #tpu.memory_space<vmem>>, vector<16x64xf32>,
        tpu.yield
      }) : () -> ()
    } else {
    }
    %c0 = arith.constant 0 : index
    %c0_1 = arith.constant 0 : index
    %3 = vector.load %arg23[%c0, %c0_1] : memref<16x64xf32, #tpu.memory_space<vmem>>, vector<16x64xf32>
    %cst = arith.constant dense<0.000000e+00> : vector<16xf32>
    %4 = vector.multi_reduction <add>, %3, %cst [1] : vector<16x64xf32> to vector<16xf32>
    %5 = vector.shape_cast %4 : vector<16xf32> to vector<16x1xf32>
    %cst_2 = arith.constant 6.400000e+01 : f32
    %6 = vector.broadcast %cst_2 : f32 to vector<16x1xf32>
    %7 = arith.divf %5, %6 : vector<16x1xf32>
    %8 = vector.broadcast %7 : vector<16x1xf32> to vector<16x64xf32>
    %9 = arith.subf %3, %8 : vector<16x64xf32>
    %10 = arith.mulf %9, %9 : vector<16x64xf32>
    %cst_3 = arith.constant dense<0.000000e+00> : vector<16xf32>
    %11 = vector.multi_reduction <add>, %10, %cst_3 [1] : vector<16x64xf32> to vector<16xf32>
    %12 = vector.shape_cast %11 : vector<16xf32> to vector<16x1xf32>
    %cst_4 = arith.constant 6.400000e+01 : f32
    %13 = vector.broadcast %cst_4 : f32 to vector<16x1xf32>
    %14 = arith.divf %12, %13 : vector<16x1xf32>
    %15 = vector.broadcast %7 : vector<16x1xf32> to vector<16x64xf32>
    %16 = arith.subf %3, %15 : vector<16x64xf32>
    %cst_5 = arith.constant 9.99999997E-7 : f32
    %17 = vector.broadcast %cst_5 : f32 to vector<16x1xf32>
    %18 = arith.addf %14, %17 : vector<16x1xf32>
    %19 = math.rsqrt %18 : vector<16x1xf32>
    %20 = vector.broadcast %19 : vector<16x1xf32> to vector<16x64xf32>
    %21 = arith.mulf %16, %20 : vector<16x64xf32>
    %c0_6 = arith.constant 0 : index
    %c0_7 = arith.constant 0 : index
    %c0_8 = arith.constant 0 : index
    %22 = vector.load %arg4[%c0_6, %c0_7, %c0_8] : memref<1x1x64xf32, #tpu.memory_space<vmem>>, vector<1x1x64xf32>
    %23 = vector.shape_cast %22 : vector<1x1x64xf32> to vector<1x64xf32>
    %24 = vector.broadcast %23 : vector<1x64xf32> to vector<16x64xf32>
    %25 = arith.mulf %21, %24 : vector<16x64xf32>
    %c0_9 = arith.constant 0 : index
    %c0_10 = arith.constant 0 : index
    %c0_11 = arith.constant 0 : index
    %26 = vector.load %arg5[%c0_9, %c0_10, %c0_11] : memref<1x1x64xf32, #tpu.memory_space<vmem>>, vector<1x1x64xf32>
    %27 = vector.shape_cast %26 : vector<1x1x64xf32> to vector<1x64xf32>
    %28 = vector.broadcast %27 : vector<1x64xf32> to vector<16x64xf32>
    %29 = arith.addf %25, %28 : vector<16x64xf32>
    %30 = arith.truncf %29 : vector<16x64xf32> to vector<16x64xbf16>
    %c0_12 = arith.constant 0 : index
    %c0_13 = arith.constant 0 : index
    %c0_14 = arith.constant 0 : index
    %31 = vector.load %arg6[%c0_12, %c0_13, %c0_14] : memref<1x64x192xbf16, #tpu.memory_space<vmem>>, vector<1x64x192xbf16>
    %32 = vector.shape_cast %31 : vector<1x64x192xbf16> to vector<64x192xbf16>
    %cst_15 = arith.constant dense<0.000000e+00> : vector<16x192xf32>
    %33 = tpu.matmul %30, %32, %cst_15 {dimension_numbers = #tpu.dot_dimension_numbers<[1], [0], [0], [1], [0, 0, 1, 1], [], []>} : vector<16x64xbf16>, vector<64x192xbf16>, vector<16x192xf32> -> vector<16x192xf32>
    %c0_16 = arith.constant 0 : index
    %c0_17 = arith.constant 0 : index
    %c0_18 = arith.constant 0 : index
    %34 = vector.load %arg7[%c0_16, %c0_17, %c0_18] : memref<1x1x192xf32, #tpu.memory_space<vmem>>, vector<1x1x192xf32>
    %35 = vector.shape_cast %34 : vector<1x1x192xf32> to vector<1x192xf32>
    %36 = vector.broadcast %35 : vector<1x192xf32> to vector<16x192xf32>
    %37 = arith.addf %33, %36 : vector<16x192xf32>
    %38 = vector.extract_strided_slice %37 {offsets = [0, 0], sizes = [16, 64], strides = [1, 1]} : vector<16x192xf32> to vector<16x64xf32>
    %39 = vector.shape_cast %38 : vector<16x64xf32> to vector<2x8x64xf32>
    %40 = vector.extract_strided_slice %37 {offsets = [0, 64], sizes = [16, 64], strides = [1, 1]} : vector<16x192xf32> to vector<16x64xf32>
    %41 = vector.shape_cast %40 : vector<16x64xf32> to vector<2x8x64xf32>
    %42 = vector.extract_strided_slice %37 {offsets = [0, 128], sizes = [16, 64], strides = [1, 1]} : vector<16x192xf32> to vector<16x64xf32>
    %43 = vector.shape_cast %42 : vector<16x64xf32> to vector<2x8x64xf32>
    %44 = tpu.iota {dimensions = array<i32: 1>} : vector<8x8xi32>
    %c5_i32 = arith.constant 5 : i32
    %45 = vector.broadcast %c5_i32 : i32 to vector<8x8xi32>
    %46 = arith.cmpi slt, %44, %45 : vector<8x8xi32>
    %cst_19 = arith.constant 0.000000e+00 : f32
    %cst_20 = arith.constant -1.000000e+30 : f32
    %47 = vector.broadcast %cst_19 : f32 to vector<8x8xf32>
    %48 = vector.broadcast %cst_20 : f32 to vector<8x8xf32>
    %49 = arith.select %46, %47, %48 : vector<8x8xi1>, vector<8x8xf32>
    %50 = vector.extract_strided_slice %39 {offsets = [0, 0, 0], sizes = [2, 8, 32], strides = [1, 1, 1]} : vector<2x8x64xf32> to vector<2x8x32xf32>
    %51 = vector.extract_strided_slice %41 {offsets = [0, 0, 0], sizes = [2, 8, 32], strides = [1, 1, 1]} : vector<2x8x64xf32> to vector<2x8x32xf32>
    "tpu.trace_start"() <{level = 10 : i32, message = "bqd,bkd->bqk"}> : () -> ()
    %cst_21 = arith.constant dense<0.000000e+00> : vector<2x8x8xf32>
    %52 = tpu.matmul %50, %51, %cst_21 {dimension_numbers = #tpu.dot_dimension_numbers<[2], [2], [1], [1], [0, 0, 0, 1, 1, 1], [0], [0]>} : vector<2x8x32xf32>, vector<2x8x32xf32>, vector<2x8x8xf32> -> vector<2x8x8xf32>
    "tpu.trace_stop"() : () -> ()
    %53 = vector.shape_cast %49 : vector<8x8xf32> to vector<1x8x8xf32>
    %54 = vector.broadcast %53 : vector<1x8x8xf32> to vector<2x8x8xf32>
    %55 = arith.addf %52, %54 : vector<2x8x8xf32>
    %cst_22 = arith.constant dense<0xFF800000> : vector<2x8xf32>
    %56 = vector.multi_reduction <maximumf>, %55, %cst_22 [2] : vector<2x8x8xf32> to vector<2x8xf32>
    %57 = vector.shape_cast %56 : vector<2x8xf32> to vector<2x8x1xf32>
    %58 = vector.broadcast %57 : vector<2x8x1xf32> to vector<2x8x8xf32>
    %59 = arith.subf %55, %58 : vector<2x8x8xf32>
    %60 = math.exp %59 : vector<2x8x8xf32>
    %cst_23 = arith.constant dense<0.000000e+00> : vector<2x8xf32>
    %61 = vector.multi_reduction <add>, %60, %cst_23 [2] : vector<2x8x8xf32> to vector<2x8xf32>
    %62 = vector.shape_cast %61 : vector<2x8xf32> to vector<2x8x1xf32>
    %63 = tpu.reciprocal %62 {approx = true} : vector<2x8x1xf32> -> vector<2x8x1xf32>
    %64 = vector.broadcast %63 : vector<2x8x1xf32> to vector<2x8x8xf32>
    %65 = arith.mulf %60, %64 : vector<2x8x8xf32>
    %66 = vector.extract_strided_slice %43 {offsets = [0, 0, 0], sizes = [2, 8, 32], strides = [1, 1, 1]} : vector<2x8x64xf32> to vector<2x8x32xf32>
    "tpu.trace_start"() <{level = 10 : i32, message = "bqk,bkd->bqd"}> : () -> ()
    %cst_24 = arith.constant dense<0.000000e+00> : vector<2x8x32xf32>
    %67 = tpu.matmul %65, %66, %cst_24 {dimension_numbers = #tpu.dot_dimension_numbers<[2], [1], [1], [2], [0, 0, 0, 1, 1, 2], [0], [0]>} : vector<2x8x8xf32>, vector<2x8x32xf32>, vector<2x8x32xf32> -> vector<2x8x32xf32>
    "tpu.trace_stop"() : () -> ()
    %68 = vector.extract_strided_slice %39 {offsets = [0, 0, 32], sizes = [2, 8, 32], strides = [1, 1, 1]} : vector<2x8x64xf32> to vector<2x8x32xf32>
    %69 = vector.extract_strided_slice %41 {offsets = [0, 0, 32], sizes = [2, 8, 32], strides = [1, 1, 1]} : vector<2x8x64xf32> to vector<2x8x32xf32>
    "tpu.trace_start"() <{level = 10 : i32, message = "bqd,bkd->bqk"}> : () -> ()
    %cst_25 = arith.constant dense<0.000000e+00> : vector<2x8x8xf32>
    %70 = tpu.matmul %68, %69, %cst_25 {dimension_numbers = #tpu.dot_dimension_numbers<[2], [2], [1], [1], [0, 0, 0, 1, 1, 1], [0], [0]>} : vector<2x8x32xf32>, vector<2x8x32xf32>, vector<2x8x8xf32> -> vector<2x8x8xf32>
    "tpu.trace_stop"() : () -> ()
    %71 = vector.shape_cast %49 : vector<8x8xf32> to vector<1x8x8xf32>
    %72 = vector.broadcast %71 : vector<1x8x8xf32> to vector<2x8x8xf32>
    %73 = arith.addf %70, %72 : vector<2x8x8xf32>
    %cst_26 = arith.constant dense<0xFF800000> : vector<2x8xf32>
    %74 = vector.multi_reduction <maximumf>, %73, %cst_26 [2] : vector<2x8x8xf32> to vector<2x8xf32>
    %75 = vector.shape_cast %74 : vector<2x8xf32> to vector<2x8x1xf32>
    %76 = vector.broadcast %75 : vector<2x8x1xf32> to vector<2x8x8xf32>
    %77 = arith.subf %73, %76 : vector<2x8x8xf32>
    %78 = math.exp %77 : vector<2x8x8xf32>
    %cst_27 = arith.constant dense<0.000000e+00> : vector<2x8xf32>
    %79 = vector.multi_reduction <add>, %78, %cst_27 [2] : vector<2x8x8xf32> to vector<2x8xf32>
    %80 = vector.shape_cast %79 : vector<2x8xf32> to vector<2x8x1xf32>
    %81 = tpu.reciprocal %80 {approx = true} : vector<2x8x1xf32> -> vector<2x8x1xf32>
    %82 = vector.broadcast %81 : vector<2x8x1xf32> to vector<2x8x8xf32>
    %83 = arith.mulf %78, %82 : vector<2x8x8xf32>
    %84 = vector.extract_strided_slice %43 {offsets = [0, 0, 32], sizes = [2, 8, 32], strides = [1, 1, 1]} : vector<2x8x64xf32> to vector<2x8x32xf32>
    "tpu.trace_start"() <{level = 10 : i32, message = "bqk,bkd->bqd"}> : () -> ()
    %cst_28 = arith.constant dense<0.000000e+00> : vector<2x8x32xf32>
    %85 = tpu.matmul %83, %84, %cst_28 {dimension_numbers = #tpu.dot_dimension_numbers<[2], [1], [1], [2], [0, 0, 0, 1, 1, 2], [0], [0]>} : vector<2x8x8xf32>, vector<2x8x32xf32>, vector<2x8x32xf32> -> vector<2x8x32xf32>
    "tpu.trace_stop"() : () -> ()
    %86 = tpu.concatenate %67, %85 in 2 : vector<2x8x32xf32>, vector<2x8x32xf32> -> vector<2x8x64xf32>
    %87 = vector.shape_cast %86 : vector<2x8x64xf32> to vector<16x64xf32>
    %88 = arith.truncf %87 : vector<16x64xf32> to vector<16x64xbf16>
    %c0_29 = arith.constant 0 : index
    %c0_30 = arith.constant 0 : index
    %c0_31 = arith.constant 0 : index
    %89 = vector.load %arg8[%c0_29, %c0_30, %c0_31] : memref<1x64x64xbf16, #tpu.memory_space<vmem>>, vector<1x64x64xbf16>
    %90 = vector.shape_cast %89 : vector<1x64x64xbf16> to vector<64x64xbf16>
    %cst_32 = arith.constant dense<0.000000e+00> : vector<16x64xf32>
    %91 = tpu.matmul %88, %90, %cst_32 {dimension_numbers = #tpu.dot_dimension_numbers<[1], [0], [0], [1], [0, 0, 1, 1], [], []>} : vector<16x64xbf16>, vector<64x64xbf16>, vector<16x64xf32> -> vector<16x64xf32>
    %c0_33 = arith.constant 0 : index
    %c0_34 = arith.constant 0 : index
    %c0_35 = arith.constant 0 : index
    %92 = vector.load %arg9[%c0_33, %c0_34, %c0_35] : memref<1x1x64xf32, #tpu.memory_space<vmem>>, vector<1x1x64xf32>
    %93 = vector.shape_cast %92 : vector<1x1x64xf32> to vector<1x64xf32>
    %94 = vector.broadcast %93 : vector<1x64xf32> to vector<16x64xf32>
    %95 = arith.addf %91, %94 : vector<16x64xf32>
    %96 = arith.addf %3, %95 : vector<16x64xf32>
    %cst_36 = arith.constant dense<0.000000e+00> : vector<16xf32>
    %97 = vector.multi_reduction <add>, %96, %cst_36 [1] : vector<16x64xf32> to vector<16xf32>
    %98 = vector.shape_cast %97 : vector<16xf32> to vector<16x1xf32>
    %cst_37 = arith.constant 6.400000e+01 : f32
    %99 = vector.broadcast %cst_37 : f32 to vector<16x1xf32>
    %100 = arith.divf %98, %99 : vector<16x1xf32>
    %101 = vector.broadcast %100 : vector<16x1xf32> to vector<16x64xf32>
    %102 = arith.subf %96, %101 : vector<16x64xf32>
    %103 = arith.mulf %102, %102 : vector<16x64xf32>
    %cst_38 = arith.constant dense<0.000000e+00> : vector<16xf32>
    %104 = vector.multi_reduction <add>, %103, %cst_38 [1] : vector<16x64xf32> to vector<16xf32>
    %105 = vector.shape_cast %104 : vector<16xf32> to vector<16x1xf32>
    %cst_39 = arith.constant 6.400000e+01 : f32
    %106 = vector.broadcast %cst_39 : f32 to vector<16x1xf32>
    %107 = arith.divf %105, %106 : vector<16x1xf32>
    %108 = vector.broadcast %100 : vector<16x1xf32> to vector<16x64xf32>
    %109 = arith.subf %96, %108 : vector<16x64xf32>
    %cst_40 = arith.constant 9.99999997E-7 : f32
    %110 = vector.broadcast %cst_40 : f32 to vector<16x1xf32>
    %111 = arith.addf %107, %110 : vector<16x1xf32>
    %112 = math.rsqrt %111 : vector<16x1xf32>
    %113 = vector.broadcast %112 : vector<16x1xf32> to vector<16x64xf32>
    %114 = arith.mulf %109, %113 : vector<16x64xf32>
    %c0_41 = arith.constant 0 : index
    %c0_42 = arith.constant 0 : index
    %c0_43 = arith.constant 0 : index
    %115 = vector.load %arg10[%c0_41, %c0_42, %c0_43] : memref<1x1x64xf32, #tpu.memory_space<vmem>>, vector<1x1x64xf32>
    %116 = vector.shape_cast %115 : vector<1x1x64xf32> to vector<1x64xf32>
    %117 = vector.broadcast %116 : vector<1x64xf32> to vector<16x64xf32>
    %118 = arith.mulf %114, %117 : vector<16x64xf32>
    %c0_44 = arith.constant 0 : index
    %c0_45 = arith.constant 0 : index
    %c0_46 = arith.constant 0 : index
    %119 = vector.load %arg11[%c0_44, %c0_45, %c0_46] : memref<1x1x64xf32, #tpu.memory_space<vmem>>, vector<1x1x64xf32>
    %120 = vector.shape_cast %119 : vector<1x1x64xf32> to vector<1x64xf32>
    %121 = vector.broadcast %120 : vector<1x64xf32> to vector<16x64xf32>
    %122 = arith.addf %118, %121 : vector<16x64xf32>
    %123 = arith.truncf %122 : vector<16x64xf32> to vector<16x64xbf16>
    %c0_47 = arith.constant 0 : index
    %c0_48 = arith.constant 0 : index
    %c0_49 = arith.constant 0 : index
    %124 = vector.load %arg12[%c0_47, %c0_48, %c0_49] : memref<1x64x256xbf16, #tpu.memory_space<vmem>>, vector<1x64x256xbf16>
    %125 = vector.shape_cast %124 : vector<1x64x256xbf16> to vector<64x256xbf16>
    %cst_50 = arith.constant dense<0.000000e+00> : vector<16x256xf32>
    %126 = tpu.matmul %123, %125, %cst_50 {dimension_numbers = #tpu.dot_dimension_numbers<[1], [0], [0], [1], [0, 0, 1, 1], [], []>} : vector<16x64xbf16>, vector<64x256xbf16>, vector<16x256xf32> -> vector<16x256xf32>
    %c0_51 = arith.constant 0 : index
    %c0_52 = arith.constant 0 : index
    %c0_53 = arith.constant 0 : index
    %127 = vector.load %arg13[%c0_51, %c0_52, %c0_53] : memref<1x1x256xf32, #tpu.memory_space<vmem>>, vector<1x1x256xf32>
    %128 = vector.shape_cast %127 : vector<1x1x256xf32> to vector<1x256xf32>
    %129 = vector.broadcast %128 : vector<1x256xf32> to vector<16x256xf32>
    %130 = arith.addf %126, %129 : vector<16x256xf32>
    %131 = arith.mulf %130, %130 : vector<16x256xf32>
    %132 = arith.mulf %130, %131 : vector<16x256xf32>
    %cst_54 = arith.constant 4.471500e-02 : f32
    %133 = vector.broadcast %cst_54 : f32 to vector<16x256xf32>
    %134 = arith.mulf %133, %132 : vector<16x256xf32>
    %135 = arith.addf %130, %134 : vector<16x256xf32>
    %cst_55 = arith.constant 0.797884583 : f32
    %136 = vector.broadcast %cst_55 : f32 to vector<16x256xf32>
    %137 = arith.mulf %136, %135 : vector<16x256xf32>
    %138 = math.tanh %137 : vector<16x256xf32>
    %cst_56 = arith.constant 1.000000e+00 : f32
    %139 = vector.broadcast %cst_56 : f32 to vector<16x256xf32>
    %140 = arith.addf %139, %138 : vector<16x256xf32>
    %cst_57 = arith.constant 5.000000e-01 : f32
    %141 = vector.broadcast %cst_57 : f32 to vector<16x256xf32>
    %142 = arith.mulf %141, %140 : vector<16x256xf32>
    %143 = arith.mulf %130, %142 : vector<16x256xf32>
    %144 = arith.truncf %143 : vector<16x256xf32> to vector<16x256xbf16>
    %c0_58 = arith.constant 0 : index
    %c0_59 = arith.constant 0 : index
    %c0_60 = arith.constant 0 : index
    %145 = vector.load %arg14[%c0_58, %c0_59, %c0_60] : memref<1x256x64xbf16, #tpu.memory_space<vmem>>, vector<1x256x64xbf16>
    %146 = vector.shape_cast %145 : vector<1x256x64xbf16> to vector<256x64xbf16>
    %cst_61 = arith.constant dense<0.000000e+00> : vector<16x64xf32>
    %147 = tpu.matmul %144, %146, %cst_61 {dimension_numbers = #tpu.dot_dimension_numbers<[1], [0], [0], [1], [0, 0, 1, 1], [], []>} : vector<16x256xbf16>, vector<256x64xbf16>, vector<16x64xf32> -> vector<16x64xf32>
    %c0_62 = arith.constant 0 : index
    %c0_63 = arith.constant 0 : index
    %c0_64 = arith.constant 0 : index
    %148 = vector.load %arg15[%c0_62, %c0_63, %c0_64] : memref<1x1x64xf32, #tpu.memory_space<vmem>>, vector<1x1x64xf32>
    %149 = vector.shape_cast %148 : vector<1x1x64xf32> to vector<1x64xf32>
    %150 = vector.broadcast %149 : vector<1x64xf32> to vector<16x64xf32>
    %151 = arith.addf %147, %150 : vector<16x64xf32>
    %152 = arith.addf %96, %151 : vector<16x64xf32>
    %c0_65 = arith.constant 0 : index
    %c0_66 = arith.constant 0 : index
    %153 = vector.load %arg23[%c0_65, %c0_66] : memref<16x64xf32, #tpu.memory_space<vmem>>, vector<16x64xf32>
    tpu.vector_store %arg23[%c0_65, %c0_66], %152 {strides = array<i32>} : memref<16x64xf32, #tpu.memory_space<vmem>>, vector<16x64xf32>,
    %c1_i32 = arith.constant 1 : i32
    %154 = arith.cmpi eq, %arg0, %c1_i32 : i32
    %155 = arith.extui %154 : i1 to i32
    %c0_i32_67 = arith.constant 0 : i32
    %156 = arith.cmpi ne, %155, %c0_i32_67 : i32
    scf.if %156 {
      %157 = vector.shape_cast %152 : vector<16x64xf32> to vector<2x8x64xf32>
      %158 = vector.extract_strided_slice %157 {offsets = [0, 0, 0], sizes = [2, 1, 64], strides = [1, 1, 1]} : vector<2x8x64xf32> to vector<2x1x64xf32>
      %159 = vector.shape_cast %158 : vector<2x1x64xf32> to vector<2x64xf32>
      %cst_68 = arith.constant dense<0.000000e+00> : vector<2xf32>
      %160 = vector.multi_reduction <add>, %159, %cst_68 [1] : vector<2x64xf32> to vector<2xf32>
      %161 = vector.shape_cast %160 : vector<2xf32> to vector<2x1xf32>
      %cst_69 = arith.constant 6.400000e+01 : f32
      %162 = vector.broadcast %cst_69 : f32 to vector<2x1xf32>
      %163 = arith.divf %161, %162 : vector<2x1xf32>
      %164 = vector.broadcast %163 : vector<2x1xf32> to vector<2x64xf32>
      %165 = arith.subf %159, %164 : vector<2x64xf32>
      %166 = arith.mulf %165, %165 : vector<2x64xf32>
      %cst_70 = arith.constant dense<0.000000e+00> : vector<2xf32>
      %167 = vector.multi_reduction <add>, %166, %cst_70 [1] : vector<2x64xf32> to vector<2xf32>
      %168 = vector.shape_cast %167 : vector<2xf32> to vector<2x1xf32>
      %cst_71 = arith.constant 6.400000e+01 : f32
      %169 = vector.broadcast %cst_71 : f32 to vector<2x1xf32>
      %170 = arith.divf %168, %169 : vector<2x1xf32>
      %171 = vector.broadcast %163 : vector<2x1xf32> to vector<2x64xf32>
      %172 = arith.subf %159, %171 : vector<2x64xf32>
      %cst_72 = arith.constant 9.99999997E-7 : f32
      %173 = vector.broadcast %cst_72 : f32 to vector<2x1xf32>
      %174 = arith.addf %170, %173 : vector<2x1xf32>
      %175 = math.rsqrt %174 : vector<2x1xf32>
      %176 = vector.broadcast %175 : vector<2x1xf32> to vector<2x64xf32>
      %177 = arith.mulf %172, %176 : vector<2x64xf32>
      %c0_73 = arith.constant 0 : index
      %c0_74 = arith.constant 0 : index
      %178 = vector.load %arg16[%c0_73, %c0_74] : memref<1x64xf32, #tpu.memory_space<vmem>>, vector<1x64xf32>
      %179 = vector.broadcast %178 : vector<1x64xf32> to vector<2x64xf32>
      %180 = arith.mulf %177, %179 : vector<2x64xf32>
      %c0_75 = arith.constant 0 : index
      %c0_76 = arith.constant 0 : index
      %181 = vector.load %arg17[%c0_75, %c0_76] : memref<1x64xf32, #tpu.memory_space<vmem>>, vector<1x64xf32>
      %182 = vector.broadcast %181 : vector<1x64xf32> to vector<2x64xf32>
      %183 = arith.addf %180, %182 : vector<2x64xf32>
      %c0_77 = arith.constant 0 : index
      %c0_78 = arith.constant 0 : index
      %184 = vector.load %arg21[%c0_77, %c0_78] : memref<2x64xf32, #tpu.memory_space<vmem>>, vector<2x64xf32>
      tpu.vector_store %arg21[%c0_77, %c0_78], %183 {strides = array<i32>} : memref<2x64xf32, #tpu.memory_space<vmem>>, vector<2x64xf32>,
      %cst_79 = arith.constant dense<0.000000e+00> : vector<64xf32>
      %185 = vector.multi_reduction <add>, %183, %cst_79 [0] : vector<2x64xf32> to vector<64xf32>
      %186 = vector.shape_cast %185 : vector<64xf32> to vector<1x64xf32>
      %cst_80 = arith.constant 2.000000e+00 : f32
      %187 = vector.broadcast %cst_80 : f32 to vector<1x64xf32>
      %188 = arith.divf %186, %187 : vector<1x64xf32>
      %189 = vector.broadcast %188 : vector<1x64xf32> to vector<2x64xf32>
      %190 = arith.subf %183, %189 : vector<2x64xf32>
      %191 = arith.mulf %190, %190 : vector<2x64xf32>
      %cst_81 = arith.constant dense<0.000000e+00> : vector<64xf32>
      %192 = vector.multi_reduction <add>, %191, %cst_81 [0] : vector<2x64xf32> to vector<64xf32>
      %193 = vector.shape_cast %192 : vector<64xf32> to vector<1x64xf32>
      %cst_82 = arith.constant 2.000000e+00 : f32
      %194 = vector.broadcast %cst_82 : f32 to vector<1x64xf32>
      %195 = arith.divf %193, %194 : vector<1x64xf32>
      %196 = vector.broadcast %188 : vector<1x64xf32> to vector<2x64xf32>
      %197 = arith.subf %183, %196 : vector<2x64xf32>
      %cst_83 = arith.constant 9.99999974E-6 : f32
      %198 = vector.broadcast %cst_83 : f32 to vector<1x64xf32>
      %199 = arith.addf %195, %198 : vector<1x64xf32>
      %200 = math.rsqrt %199 : vector<1x64xf32>
      %201 = vector.broadcast %200 : vector<1x64xf32> to vector<2x64xf32>
      %202 = arith.mulf %197, %201 : vector<2x64xf32>
      %c0_84 = arith.constant 0 : index
      %c0_85 = arith.constant 0 : index
      %203 = vector.load %arg18[%c0_84, %c0_85] : memref<1x64xf32, #tpu.memory_space<vmem>>, vector<1x64xf32>
      %204 = vector.broadcast %203 : vector<1x64xf32> to vector<2x64xf32>
      %205 = arith.mulf %202, %204 : vector<2x64xf32>
      %c0_86 = arith.constant 0 : index
      %c0_87 = arith.constant 0 : index
      %206 = vector.load %arg19[%c0_86, %c0_87] : memref<1x64xf32, #tpu.memory_space<vmem>>, vector<1x64xf32>
      %207 = vector.broadcast %206 : vector<1x64xf32> to vector<2x64xf32>
      %208 = arith.addf %205, %207 : vector<2x64xf32>
      %209 = arith.truncf %208 : vector<2x64xf32> to vector<2x64xbf16>
      %c0_88 = arith.constant 0 : index
      %c0_89 = arith.constant 0 : index
      %210 = vector.load %arg20[%c0_88, %c0_89] : memref<64x16xbf16, #tpu.memory_space<vmem>>, vector<64x16xbf16>
      %cst_90 = arith.constant dense<0.000000e+00> : vector<2x16xf32>
      %211 = tpu.matmul %209, %210, %cst_90 {dimension_numbers = #tpu.dot_dimension_numbers<[1], [0], [0], [1], [0, 0, 1, 1], [], []>} : vector<2x64xbf16>, vector<64x16xbf16>, vector<2x16xf32> -> vector<2x16xf32>
      %c0_91 = arith.constant 0 : index
      %c0_92 = arith.constant 0 : index
      %212 = vector.load %arg22[%c0_91, %c0_92] : memref<2x16xf32, #tpu.memory_space<vmem>>, vector<2x16xf32>
      tpu.vector_store %arg22[%c0_91, %c0_92], %211 {strides = array<i32>} : memref<2x16xf32, #tpu.memory_space<vmem>>, vector<2x16xf32>,
    } else {
    }
    return
  }
  func.func @transform_3(%arg0: i32) -> (i32, i32, i32) {
    %c0_i32 = arith.constant 0 : i32
    %c0_i32_0 = arith.constant 0 : i32
    %c0_i32_1 = arith.constant 0 : i32
    return %arg0, %c0_i32, %c0_i32_0 : i32, i32, i32
  }
  func.func @transform_4(%arg0: i32) -> (i32, i32, i32) {
    %c0_i32 = arith.constant 0 : i32
    %c0_i32_0 = arith.constant 0 : i32
    %c0_i32_1 = arith.constant 0 : i32
    return %arg0, %c0_i32, %c0_i32_0 : i32, i32, i32
  }
  func.func @transform_5(%arg0: i32) -> (i32, i32, i32) {
    %c0_i32 = arith.constant 0 : i32
    %c0_i32_0 = arith.constant 0 : i32
    %c0_i32_1 = arith.constant 0 : i32
    return %arg0, %c0_i32, %c0_i32_0 : i32, i32, i32
  }
  func.func @transform_6(%arg0: i32) -> (i32, i32, i32) {
    %c0_i32 = arith.constant 0 : i32
    %c0_i32_0 = arith.constant 0 : i32
    %c0_i32_1 = arith.constant 0 : i32
    return %arg0, %c0_i32, %c0_i32_0 : i32, i32, i32
  }
  func.func @transform_7(%arg0: i32) -> (i32, i32, i32) {
    %c0_i32 = arith.constant 0 : i32
    %c0_i32_0 = arith.constant 0 : i32
    %c0_i32_1 = arith.constant 0 : i32
    return %arg0, %c0_i32, %c0_i32_0 : i32, i32, i32
  }
  func.func @transform_8(%arg0: i32) -> (i32, i32, i32) {
    %c0_i32 = arith.constant 0 : i32
    %c0_i32_0 = arith.constant 0 : i32
    %c0_i32_1 = arith.constant 0 : i32
    return %arg0, %c0_i32, %c0_i32_0 : i32, i32, i32
  }
  func.func @transform_9(%arg0: i32) -> (i32, i32, i32) {
    %c0_i32 = arith.constant 0 : i32
    %c0_i32_0 = arith.constant 0 : i32
    %c0_i32_1 = arith.constant 0 : i32
    return %arg0, %c0_i32, %c0_i32_0 : i32, i32, i32
  }
  func.func @transform_10(%arg0: i32) -> (i32, i32, i32) {
    %c0_i32 = arith.constant 0 : i32
    %c0_i32_0 = arith.constant 0 : i32
    %c0_i32_1 = arith.constant 0 : i32
    return %arg0, %c0_i32, %c0_i32_0 : i32, i32, i32
  }
  func.func @transform_11(%arg0: i32) -> (i32, i32, i32) {
    %c0_i32 = arith.constant 0 : i32
    %c0_i32_0 = arith.constant 0 : i32
    %c0_i32_1 = arith.constant 0 : i32
    return %arg0, %c0_i32, %c0_i32_0 : i32, i32, i32
  }
  func.func @transform_12(%arg0: i32) -> (i32, i32, i32) {
    %c0_i32 = arith.constant 0 : i32
    %c0_i32_0 = arith.constant 0 : i32
    %c0_i32_1 = arith.constant 0 : i32
    return %arg0, %c0_i32, %c0_i32_0 : i32, i32, i32
  }
  func.func @transform_13(%arg0: i32) -> (i32, i32, i32) {
    %c0_i32 = arith.constant 0 : i32
    %c0_i32_0 = arith.constant 0 : i32
    %c0_i32_1 = arith.constant 0 : i32
    return %arg0, %c0_i32, %c0_i32_0 : i32, i32, i32
  }
  func.func @transform_14(%arg0: i32) -> (i32, i32, i32) {
    %c0_i32 = arith.constant 0 : i32
    %c0_i32_0 = arith.constant 0 : i32
    %c0_i32_1 = arith.constant 0 : i32
    return %arg0, %c0_i32, %c0_i32_0 : i32, i32, i32
  }
  func.func @transform_15(%arg0: i32) -> (i32, i32) {
    %c0_i32 = arith.constant 0 : i32
    %c0_i32_0 = arith.constant 0 : i32
    %c0_i32_1 = arith.constant 0 : i32
    return %c0_i32, %c0_i32_0 : i32, i32
  }
  func.func @transform_16(%arg0: i32) -> (i32, i32) {
    %c0_i32 = arith.constant 0 : i32
    %c0_i32_0 = arith.constant 0 : i32
    %c0_i32_1 = arith.constant 0 : i32
    return %c0_i32, %c0_i32_0 : i32, i32
  }
  func.func @transform_17(%arg0: i32) -> (i32, i32) {
    %c0_i32 = arith.constant 0 : i32
    %c0_i32_0 = arith.constant 0 : i32
    %c0_i32_1 = arith.constant 0 : i32
    return %c0_i32, %c0_i32_0 : i32, i32
  }
  func.func @transform_18(%arg0: i32) -> (i32, i32) {
    %c0_i32 = arith.constant 0 : i32
    %c0_i32_0 = arith.constant 0 : i32
    %c0_i32_1 = arith.constant 0 : i32
    return %c0_i32, %c0_i32_0 : i32, i32
  }
  func.func @transform_19(%arg0: i32) -> (i32, i32) {
    %c0_i32 = arith.constant 0 : i32
    %c0_i32_0 = arith.constant 0 : i32
    %c0_i32_1 = arith.constant 0 : i32
    return %c0_i32, %c0_i32_0 : i32, i32
  }
  func.func @transform_20(%arg0: i32) -> (i32, i32) {
    %c0_i32 = arith.constant 0 : i32
    %c0_i32_0 = arith.constant 0 : i32
    %c0_i32_1 = arith.constant 0 : i32
    return %c0_i32, %c0_i32_0 : i32, i32
  }
  func.func @transform_21(%arg0: i32) -> (i32, i32) {
    %c0_i32 = arith.constant 0 : i32
    %c0_i32_0 = arith.constant 0 : i32
    %c0_i32_1 = arith.constant 0 : i32
    return %c0_i32, %c0_i32_0 : i32, i32
  }
}

</mosaic_0001>

<bundles_post_ra>
// kernel: tpu_custom_call.1
= control target key start
LH: loop header
LB: loop body
LE: loop exit
PB: predicated region body
PF: predicated region fallthrough
CT: control target
= control target key end

     0   :  { %s3598_s0 = inlined_call_operand.vmem [shape: bf16[16,192], index: 0, kind: input, shape index: {}]   ;;  %s3599_s1 = inlined_call_operand.vmem [shape: bf16[192,64], index: 1, kind: input, shape index: {}]   ;;  %s3600_s2 = inlined_call_operand.vmem [shape: f32[16,64], index: 2, kind: input, shape index: {}]   ;;  %s3601_s3 = inlined_call_operand.vmem [shape: f32[2,1,64], index: 3, kind: input, shape index: {}]   ;;  %s3602_s4 = inlined_call_operand.vmem [shape: f32[2,1,64], index: 4, kind: input, shape index: {}]   ;;  %s3603_s5 = inlined_call_operand.vmem [shape: bf16[2,64,192], index: 5, kind: input, shape index: {}]   ;;  %s3604_s6 = inlined_call_operand.vmem [shape: f32[2,1,192], index: 6, kind: input, shape index: {}]   ;;  %s3605_s7 = inlined_call_operand.vmem [shape: bf16[2,64,64], index: 7, kind: input, shape index: {}]   ;;  %s3606_s8 = inlined_call_operand.vmem [shape: f32[2,1,64], index: 8, kind: input, shape index: {}]   ;;  %s3607_s9 = inlined_call_operand.vmem [shape: f32[2,1,64], index: 9, kind: input, shape index: {}]   ;;  %s3608_s10 = inlined_call_operand.vmem [shape: f32[2,1,64], index: 10, kind: input, shape index: {}]   ;;  %s3609_s11 = inlined_call_operand.vmem [shape: bf16[2,64,256], index: 11, kind: input, shape index: {}]   ;;  %s3610_s12 = inlined_call_operand.vmem [shape: f32[2,1,256], index: 12, kind: input, shape index: {}]   ;;  %s3611_s13 = inlined_call_operand.vmem [shape: bf16[2,256,64], index: 13, kind: input, shape index: {}]   ;;  %s3612_s14 = inlined_call_operand.vmem [shape: f32[2,1,64], index: 14, kind: input, shape index: {}]   ;;  %s3613_s15 = inlined_call_operand.vmem [shape: f32[1,64], index: 15, kind: input, shape index: {}]   ;;  %s3614_s16 = inlined_call_operand.vmem [shape: f32[1,64], index: 16, kind: input, shape index: {}]   ;;  %s3615_s17 = inlined_call_operand.vmem [shape: f32[1,64], index: 17, kind: input, shape index: {}]   ;;  %s3616_s18 = inlined_call_operand.vmem [shape: f32[1,64], index: 18, kind: input, shape index: {}]   ;;  %s3617_s19 = inlined_call_operand.vmem [shape: bf16[64,16], index: 19, kind: input, shape index: {}]   ;;  %s3618_s20 = inlined_call_operand.hbm [shape: f32[2,64], index: 20, kind: output, shape index: {0}]   ;;  %s3619_s21 = inlined_call_operand.hbm [shape: f32[2,16], index: 21, kind: output, shape index: {1}]  }
   0x1   :  { %3624 = sst [smem:[#allocation20_spill]] %s3598_s0 }
   0x2   :  { %3625 = sst [smem:[#allocation21_spill]] %s3599_s1 }
   0x3   :  { %3626 = sst [smem:[#allocation22_spill]] %s3600_s2 }
   0x4   :  { %3627 = sst [smem:[#allocation23_spill]] %s3601_s3 }
   0x5   :  { %3628 = sst [smem:[#allocation24_spill]] %s3602_s4 }
   0x6   :  { %3629 = sst [smem:[#allocation25_spill]] %s3603_s5 }
   0x7   :  { %3630 = sst [smem:[#allocation26_spill]] %s3604_s6 }
   0x8   :  { %3631 = sst [smem:[#allocation27_spill]] %s3613_s15 }
   0x9   :  { %3632 = sst [smem:[#allocation28_spill]] %s3614_s16 }
   0xa   :  { %3633 = sst [smem:[#allocation29_spill]] %s3615_s17 }
   0xb   :  { %3634 = sst [smem:[#allocation30_spill]] %s3616_s18 }
   0xc   :  { %3635 = sst [smem:[#allocation31_spill]] %s3618_s20 }
   0xd   :  { %3636 = sst [smem:[#allocation32_spill]] %s3619_s21 }
   0xe   :  { %27 = vsyncpa [#allocation4], 0 }
   0xf   :  { %28 = vsyncpa [#allocation6], 0  ;;  %s3217_s2 = smov 0  }
  0x10 LB: > { %3637 = sst [smem:[#allocation19_spill]] %s3093_s2  ;;  %s3223_s25 = sadd.s32 4294967295, %s3093_s2   ;;  %s3093_s2 = sphi %s3217_s2, %s34_s2  }
  0x11   : > { %p2702_p0 = scmp.ge.s32.totalorder %s3093_s2, 1  ;;  %p606_p1 = scmp.lt.s32.totalorder %s3093_s2, 3 }
  0x13   : > { %p607_p2 = pnand %p2702_p0, %p606_p1 }
  0x14   : > { %p696_p3 = scmp.lt.s32.totalorder (!%p607_p2), %s3223_s25, 1  ;;  %s3640_s2 = sld [smem:[#allocation25_spill]] (!%p607_p2) }
  0x15   : > { %610 = sbr.rel (%p607_p2) target bundleno = 3861 (0xf15), region = 88  ;;  %s3641_s6 = sld [smem:[#allocation26_spill]] (!%p607_p2) }
  0x16   : > { %p2713_p4 = scmp.ne.s32.totalorder (!%p607_p2), %s3223_s25, 0 }
  0x1a   : > { %s3229_s26 = scalar_select %p696_p3, %s3223_s25, 1 }
  0x1c   : > { %s2788_s22 = sshll.u32 %s3229_s26, 6  ;;  %s2705_s23 = sshll.u32 %s3229_s26, 1 }
  0x1d   : > { %s3244_s27 = scalar_lea.vmem %s3640_s2, %s2788_s22  ;;  %s3249_s20 = scalar_lea.vmem %s3641_s6, %s2705_s23 }
  0x1e   : > { %s2789_s18 = sshll.u32 %s3229_s26, 5  ;;  %s3272_s15 = scalar_lea.vmem %s3609_s11, %s2788_s22 }
  0x1f   : > { %s3259_s4 = scalar_lea.vmem %s3605_s7, %s2789_s18  ;;  %s3277_s28 = scalar_lea.vmem %s3610_s12, %s2705_s23 }
  0x20   : > { %s2791_s18 = sshll.u32 %s3229_s26, 7  ;;  %746 = sbr.rel (%p2713_p4) target bundleno = 318 (0x13e), region = 92 }
  0x21   : > { %s3283_s5 = scalar_lea.vmem %s3611_s13, %s2791_s18 }
  0x25   : > { %s3642_s24 = sld [smem:[#allocation20_spill]] }
  0x2b   : > { %v765_v0 = vld [vmem:[%s3642_s24] sm:$0xf]  ;;  %v767_v1 = vld [vmem:[%s3642_s24 + $0x8] sm:$0xf]  ;;  %v769_v2 = vld [vmem:[%s3642_s24 + $0x4] sm:$0xf] }
  0x2c   : > { %766 = vst [vmem:[#allocation7] sm:$0xf] %v765_v0  ;;  %768 = vst [vmem:[#allocation7 + $0x4] sm:$0xf] %v767_v1  ;;  %v771_v3 = vld [vmem:[%s3642_s24 + $0xc] sm:$0xf] }
  0x2d   : > { %770 = vst [vmem:[#allocation7 + $0x8] sm:$0xf] %v769_v2  ;;  %772 = vst [vmem:[#allocation7 + $0xc] sm:$0xf] %v771_v3 }
  0x2e   : > { %812 = vsyncadd [#allocation10], 256  ;;  %s3643_s30 = sld [smem:[#allocation21_spill]] }
  0x34   : > { %v847_v4 = vld [vmem:[%s3643_s30] sm:$0xff]  ;;  %v849_v5 = vld [vmem:[%s3643_s30 + $0x8] sm:$0xff]  ;;  %v851_v6 = vld [vmem:[%s3643_s30 + $0x10] sm:$0xff] }
  0x35   : > { %v853_v7 = vld [vmem:[%s3643_s30 + $0x18] sm:$0xff]  ;;  %v855_v8 = vld [vmem:[%s3643_s30 + $0x20] sm:$0xff]  ;;  %v857_v9 = vld [vmem:[%s3643_s30 + $0x28] sm:$0xff] }
  0x36   : > { %v859_v10 = vld [vmem:[%s3643_s30 + $0x30] sm:$0xff]  ;;  %v861_v11 = vld [vmem:[%s3643_s30 + $0x38] sm:$0xff]  ;;  %v863_v12 = vld [vmem:[%s3643_s30 + $0x40] sm:$0xff] }
  0x37   : > { %v865_v13 = vld [vmem:[%s3643_s30 + $0x48] sm:$0xff]  ;;  %v867_v14 = vld [vmem:[%s3643_s30 + $0x50] sm:$0xff]  ;;  %v869_v15 = vld [vmem:[%s3643_s30 + $0x58] sm:$0xff] }
  0x38   : > { %878 = vsyncadd [#allocation10 + $0x1], 1536  ;;  %s3644_s6 = sld [smem:[#allocation22_spill]] }
  0x3e   : > { %v913_v16 = vld [vmem:[%s3644_s6] sm:$0xff]  ;;  %v915_v17 = vld [vmem:[%s3644_s6 + $0x8] sm:$0xff] }
  0x3f   : > { %924 = vsyncadd [#allocation10 + $0x2], 256 }
  0x40   : > { %3077 = dma.done.wait [#allocation10], 256 }
  0x41   : > { %3078 = vsyncadd [#allocation10], 4294967040 }
  0x42   : > { %3079 = dma.done.wait [#allocation10 + $0x1], 1536 }
  0x43   : > { %3080 = vsyncadd [#allocation10 + $0x1], 4294965760 }
  0x44   : > { %3081 = dma.done.wait [#allocation10 + $0x2], 256 }
  0x45   : > { %3082 = vsyncadd [#allocation10 + $0x2], 4294967040  ;;  %v3095_v18 = vmov 0   ;;  %vm950_vm0 = vcmask 523264   ;;  %v937_v19 = vld [vmem:[#allocation7 + $0x8] sm:$0xff]  ;;  %v936_v20 = vld [vmem:[#allocation7] sm:$0xff] }
  0x46   : > { %954 = vmatprep.subr.bf16.mxu0 %v3095_v18  ;;  %2714 = vmatprep.mubr.msk.bf16.mxu0 %vm950_vm0, %v937_v19 }
  0x47   : > { %955 = vmatpush1.bf16.msra.mxu0 %v861_v11 }
  0x48   : > { %956 = vmatprep.subr.bf16.mxu0 %v3095_v18 }
  0x4b   : > { %957 = vmatpush1.bf16.msra.mxu0 %v859_v10 }
  0x4c   : > { %958 = vmatprep.subr.bf16.mxu0 %v3095_v18 }
  0x4f   : > { %959 = vmatpush1.bf16.msra.mxu0 %v857_v9 }
  0x50   : > { %960 = vmatprep.subr.bf16.mxu0 %v3095_v18 }
  0x53   : > { %961 = vmatpush1.bf16.msra.mxu0 %v855_v8 }
  0x54   : > { %962 = vmatprep.subr.bf16.mxu0 %v3095_v18 }
  0x57   : > { %963 = vmatpush1.bf16.msra.mxu0 %v853_v7 }
  0x58   : > { %964 = vmatprep.subr.bf16.mxu0 %v3095_v18 }
  0x5b   : > { %965 = vmatpush1.bf16.msra.mxu0 %v851_v6 }
  0x5c   : > { %966 = vmatprep.subr.bf16.mxu0 %v3095_v18 }
  0x5f   : > { %967 = vmatpush1.bf16.msra.mxu0 %v849_v5 }
  0x60   : > { %968 = vmatprep.subr.bf16.mxu0 %v3095_v18 }
  0x63   : > { %969 = vmatpush1.bf16.msra.mxu0 %v847_v4 }
  0x64   : > { %978 = vmatprep.subr.bf16.mxu0 %v3095_v18 }
  0x67   : > { %979 = vmatpush2.bf16.msra.mxu0 %v869_v15 }
  0x68   : > { %980 = vmatprep.subr.bf16.mxu0 %v3095_v18 }
  0x6b   : > { %981 = vmatpush2.bf16.msra.mxu0 %v867_v14 }
  0x6c   : > { %982 = vmatprep.subr.bf16.mxu0 %v3095_v18 }
  0x6f   : > { %983 = vmatpush2.bf16.msra.mxu0 %v865_v13 }
  0x70   : > { %984 = vmatprep.subr.bf16.mxu0 %v3095_v18 }
  0x73   : > { %985 = vmatpush2.bf16.msra.mxu0 %v863_v12 }
  0x76   : > { %987 = vmatmul.mubr.bf16.vlgmr.msra.gmra.mxu0 %v936_v20 }
 0x136   : > { %v988_v21 = vpop.f32.mrf.mxu0 }
 0x137   : > { %v997_v22 = vadd.f32 %v988_v21, %v913_v16 }
 0x138   : > { %v990_v23 = vpop.f32.mrf.mxu0 }
 0x139   : > { %999 = vst.msk [vmem:[#allocation2] sm:$0xff] %vm950_vm0, %v997_v22 }
 0x13a   : > { %v991_v24 = vpop.f32.mrf.mxu0 }
 0x13b   : > { %v998_v25 = vadd.f32 %v991_v24, %v915_v17 }
 0x13c   : > { %v993_v26 = vpop.f32.mrf.mxu0 }
 0x13d   : > { %1000 = vst.msk [vmem:[#allocation2 + $0x8] sm:$0xff] %vm950_vm0, %v998_v25 }
 0x13e PF: > { %vm1003_vm1 = vcmask 523264   ;;  %v2941_v41 = vld [vmem:[%s3244_s27 + $0x34] ss:$8 sps:$4 sm:$0xff]   ;;  %v2943_v42 = vld [vmem:[%s3244_s27 + $0x30] ss:$8 sps:$4 sm:$0xff]   ;;  %v3096_v45 = vmov 0   ;;  %v1060_v4 = vlaneseq  ;;  %s3649_s3 = scalar_lea.vmem %s3606_s8, %s3229_s26  ;;  %s3652_s18 = scalar_lea.vmem %s3612_s14, %s3229_s26 }
 0x13f   : > { %v2944_v43 = vld [vmem:[%s3244_s27 + $0x24] ss:$8 sps:$4 sm:$0xff]   ;;  %1121 = vmatprep.subr.bf16.mxu0 %v2941_v41  ;;  %v2946_v44 = vld [vmem:[%s3244_s27 + $0x20] ss:$8 sps:$4 sm:$0xff]   ;;  %1145 = vmatprep.mubr.bf16.mxu0 %v3096_v45  ;;  %v2947_v46 = vld [vmem:[%s3244_s27 + $0x14] ss:$8 sps:$4 sm:$0xff]  }
 0x140   : > { %v3347_v27 = vld [vmem:[#allocation2] sm:$0xff]  ;;  %1122 = vmatpush1.bf16.msra.mxu0 %v2943_v42  ;;  %v2949_v47 = vld [vmem:[%s3244_s27 + $0x10] ss:$8 sps:$4 sm:$0xff]   ;;  %s3645_s17 = sld [smem:[#allocation23_spill]]  ;;  %v3097_v3 = vmov 0.0   ;;  %v3381_v5 = vshrl.u32 %v1060_v4, 7 }
 0x141   : > { %v1004_v29 = vsel %vm1003_vm1, %v3347_v27, 0.0  ;;  %1123 = vmatprep.subr.bf16.mxu0 %v2944_v43  ;;  %v2950_v48 = vld [vmem:[%s3244_s27 + $0x4] ss:$8 sps:$4 sm:$0xff]   ;;  %v2952_v49 = vld [vmem:[%s3244_s27] ss:$8 sps:$4 sm:$0xff]   ;;  %s3647_s21 = sld [smem:[#allocation24_spill]]  ;;  %2840 = vmatprep.subr.mxu1 %v3097_v3  ;;  %s3651_s27 = scalar_lea.vmem %s3608_s10, %s3229_s26 }
 0x142   : > { %1005 = vadd.xlane.f32.xlu0 %v1004_v29  ;;  %vm3098_vm2 = vmmov 0   ;;  %v3388_v6 = vsub.s32 0, %v3381_v5  ;;  %v1058_v7 = vld [vmem:[%s3249_s20] sm:$0x3]  ;;  %s3099_s29 = smov 64   ;;  %vm1163_vm3 = vcmask 261120  }
 0x143   : > { %2842 = vmatprep.mubr.msk.f32.mxu1 %vm3098_vm2, %v3097_v3  ;;  %v1066_v14 = vsub.s32 1, %v3381_v5  ;;  %v1157_v19 = vand.u32 127, %v1060_v4  ;;  %v3100_v20 = vmov -1e+30   ;;  %vm1315_vm5 = vcmask 64512   ;;  %s3101_s20 = smov 32  }
 0x144   : > { %v3349_v28 = vld [vmem:[#allocation2 + $0x8] sm:$0xff]  ;;  %1124 = vmatpush1.bf16.msra.mxu0 %v2946_v44  ;;  %v1063_v8 = vrot.slane %v1058_v7, %v3388_v6  ;;  %s3102_s0 = smov 96   ;;  %p2772_p5 = scmp.ne.s32.totalorder %s3223_s25, 1 }
 0x145   : > { %v1007_v30 = vsel %vm1003_vm1, %v3349_v28, 0.0  ;;  %1125 = vmatprep.subr.bf16.mxu0 %v2947_v46  ;;  %v1067_v16 = vrot.slane %v1058_v7, %v1066_v14  ;;  %vm1158_vm4 = vcmp.lt.s32.totalorder %v1157_v19, 5  ;;  %s3653_s16 = sld [smem:[#allocation27_spill]] (!%p2772_p5) }
 0x146   : > { %1008 = vadd.xlane.f32.xlu0 %v1007_v30  ;;  %s3646_s2 = scalar_lea.vmem %s3645_s17, %s3229_s26  ;;  %v3409_v21 = vsel %vm1158_vm4, 0.0, %v3100_v20 }
 0x147   : > { %v2715_v58 = vld [vmem:[%s3646_s2] ss:$0 sm:$0xff]  ;;  %s3648_s1 = scalar_lea.vmem %s3647_s21, %s3229_s26  ;;  %s3654_s2 = sld [smem:[#allocation28_spill]] (!%p2772_p5) }
 0x148   : > { %1126 = vmatpush1.bf16.msra.mxu0 %v2949_v47  ;;  %v2716_v62 = vld [vmem:[%s3648_s1] ss:$0 sm:$0xff]  ;;  %s3656_s21 = sld [smem:[#allocation30_spill]] (!%p2772_p5) }
 0x149   : > { %1127 = vmatprep.subr.bf16.mxu0 %v2950_v48 }
 0x14c   : > { %1128 = vmatpush1.bf16.msra.mxu0 %v2952_v49 }
 0x14d   : > { %2865 = vmatprep.subr.mxu0 %v3097_v3 }
 0x1cb   : > { %v1006_v31 = vpop.xlane.xlu0 %1005 }
 0x1cc   : > { %v1011_v32 = vmul.f32 0.015625, %v1006_v31 }
 0x1ce   : > { %v1013_v33 = vsub.f32 %v3347_v27, %v1011_v32 }
 0x1cf   : > { %v1009_v34 = vpop.xlane.xlu0 %1008 }
 0x1d0   : > { %v1012_v35 = vmul.f32 0.015625, %v1009_v34  ;;  %v1015_v36 = vmul.f32 %v1013_v33, %v1013_v33 }
 0x1d2   : > { %v1014_v37 = vsub.f32 %v3349_v28, %v1012_v35  ;;  %v1017_v38 = vsel %vm1003_vm1, %v1015_v36, 0.0 }
 0x1d3   : > { %1018 = vadd.xlane.f32.xlu1 %v1017_v38 }
 0x1d4   : > { %v1016_v39 = vmul.f32 %v1014_v37, %v1014_v37 }
 0x1d6   : > { %v1020_v40 = vsel %vm1003_vm1, %v1016_v39, 0.0 }
 0x1d7   : > { %1021 = vadd.xlane.f32.xlu1 %v1020_v40 }
 0x25c   : > { %v1019_v50 = vpop.xlane.xlu1 %1018 }
 0x25d   : > { %v1023_v51 = vmul.f32 0.015625, %v1019_v50 }
 0x25f   : > { %v1025_v52 = vadd.f32 1e-06, %v1023_v51 }
 0x260   : > { %v1022_v53 = vpop.xlane.xlu1 %1021 }
 0x261   : > { %2985 = vrsqrt.f32 %v1025_v52  ;;  %v1024_v54 = vmul.f32 0.015625, %v1022_v53 }
 0x263   : > { %v1026_v55 = vadd.f32 1e-06, %v1024_v54 }
 0x265   : > { %2987 = vrsqrt.f32 %v1026_v55 }
 0x26e   : > { %v2986_v56 = vpop.eup %2985 }
 0x26f   : > { %v1029_v57 = vmul.f32 %v2986_v56, %v1013_v33 }
 0x271   : > { %v1038_v61 = vmul.f32 %v2715_v58, %v1029_v57 }
 0x272   : > { %v2988_v59 = vpop.eup %2987 }
 0x273   : > { %v1030_v60 = vmul.f32 %v2988_v59, %v1014_v37  ;;  %v1047_v0 = vadd.f32 %v2716_v62, %v1038_v61 }
 0x275   : > { %v1039_v63 = vmul.f32 %v2715_v58, %v1030_v60 }
 0x277   : > { %v1048_v1 = vadd.f32 %v2716_v62, %v1039_v63 }
 0x279   : > { %v1049_v2 = vpack.c.bf16 %v1048_v1, %v1047_v0 }
 0x27b   : > { %2725 = vmatmul.mubr.msk.bf16.vlgmr.msra.gmra.mxu0 %vm1003_vm1, %v1049_v2 }
 0x27c   : > { %2867 = vmatprep.mubr.msk.f32.mxu0 %vm3098_vm2, %v3097_v3 }
 0x33b   : > { %v1147_v9 = vpop.f32.mrf.mxu0 }
 0x33c   : > { %v1148_v10 = vadd.f32 %v1147_v9, %v1063_v8 }
 0x33d   : > { %v1149_v11 = vpop.f32.mrf.mxu0 }
 0x33e   : > { %1161 = vrot.lane.b32.xlu0 %v1148_v10, %s3099_s29  ;;  %v3402_v18 = vadd.f32 %v1149_v11, %v1067_v16 }
 0x33f   : > { %v1151_v12 = vpop.f32.mrf.mxu0 }
 0x340   : > { %v1152_v13 = vadd.f32 %v1151_v12, %v1063_v8 }
 0x341   : > { %v1153_v48 = vpop.f32.mrf.mxu0 }
 0x342   : > { %1239 = vrot.lane.b32.xlu1 %v1152_v13, %s3099_s29  ;;  %v1154_v51 = vadd.f32 %v1153_v48, %v1067_v16 }
 0x3b0   : > { %v1162_v15 = vpop.permute.xlu0 %1161 }
 0x3b1   : > { %2841 = vmatpush3.xpose.msk.msra.mxu1 %vm1163_vm3, %v1162_v15 }
 0x3b2   : > { %2845 = vmatprep.subr.mxu1 %v3097_v3 }
 0x3b4   : > { %v1240_v17 = vpop.permute.xlu1 %1239  ;;  %2843 = vmatmul.mubr.msk.f32.vlgmr.msra.gmra.mxu1 %vm1163_vm3, %v1148_v10 }
 0x3b5   : > { %2846 = vmatpush3.xpose.msk.msra.mxu1 %vm1163_vm3, %v1240_v17  ;;  %2847 = vmatprep.mubr.msk.f32.mxu1 %vm3098_vm2, %v3097_v3 }
 0x3b6   : > { %2850 = vmatprep.subr.mxu1 %v3097_v3 }
 0x3b8   : > { %2848 = vmatmul.mubr.msk.f32.vlgmr.msra.gmra.mxu1 %vm1163_vm3, %v1152_v13 }
 0x3b9   : > { %2851 = vmatpush3.msra.mxu1 %v3402_v18  ;;  %2852 = vmatprep.mubr.msk.f32.mxu1 %vm3098_vm2, %v3097_v3 }
 0x3ba   : > { %2855 = vmatprep.subr.mxu1 %v3097_v3 }
 0x474   : > { %v1234_v22 = vpop.f32.mrf.mxu1 }
 0x475   : > { %v1235_v23 = vadd.f32 %v1234_v22, %v3409_v21 }
 0x476   : > { %v2844_v24 = vpop.f32.mrf.mxu1 }
 0x477   : > { %v1316_v25 = vsel %vm1315_vm5, %v1235_v23, -inf }
 0x478   : > { %1317 = vmax.xlane.f32.xlu1 %v1316_v25  ;;  %v1311_v26 = vpop.f32.mrf.mxu1 }
 0x479   : > { %v1312_v29 = vadd.f32 %v1311_v26, %v3409_v21  ;;  %v2954_v26 = vld [vmem:[%s3259_s4 + $0x10] sm:$0xff]  }
 0x47a   : > { %v2849_v30 = vpop.f32.mrf.mxu1 }
 0x47b   : > { %v1319_v31 = vsel %vm1315_vm5, %v1312_v29, -inf }
 0x47c   : > { %1320 = vmax.xlane.f32.xlu0 %v1319_v31 }
 0x489   : > { %1564 = vrot.lane.b32.xlu1 %v1152_v13, %s3101_s20 }
 0x48d   : > { %1484 = vrot.lane.b32.xlu1 %v1148_v10, %s3102_s0 }
 0x501   : > { %v1318_v32 = vpop.xlane.xlu1 %1317 }
 0x502   : > { %v1322_v33 = vsub.f32 %v1235_v23, %v1318_v32  ;;  %v2956_v32 = vld [vmem:[%s3259_s4] sm:$0xff]  }
 0x504   : > { %v1324_v34 = vmul.f32 1.442695, %v1322_v33 }
 0x505   : > { %v1565_v35 = vpop.permute.xlu1 %1564  ;;  %v1321_v36 = vpop.xlane.xlu0 %1320 }
 0x506   : > { %2989 = vpow2.f32 %v1324_v34  ;;  %v1323_v37 = vsub.f32 %v1312_v29, %v1321_v36  ;;  %2866 = vmatpush3.xpose.msk.msra.mxu0 %vm1163_vm3, %v1565_v35  ;;  %v2955_v29 = vld [vmem:[%s3259_s4 + $0x8] sm:$0xff]  }
 0x507   : > { %2875 = vmatprep.subr.mxu0 %v3097_v3 }
 0x508   : > { %v1326_v38 = vmul.f32 1.442695, %v1323_v37 }
 0x509   : > { %v1485_v43 = vpop.permute.xlu1 %1484 }
 0x50a   : > { %2991 = vpow2.f32 %v1326_v38 }
 0x513   : > { %v2990_v39 = vpop.eup %2989 }
 0x514   : > { %v1328_v40 = vsel %vm1315_vm5, %v2990_v39, 0.0 }
 0x515   : > { %1329 = vadd.xlane.f32.xlu0 %v1328_v40 }
 0x517   : > { %v2992_v41 = vpop.eup %2991 }
 0x518   : > { %v1331_v42 = vsel %vm1315_vm5, %v2992_v41, 0.0 }
 0x519   : > { %1332 = vadd.xlane.f32.xlu1 %v1331_v42 }
 0x52a   : > { %1562 = vrot.lane.b32.xlu1 %v1152_v13, %s3102_s0 }
 0x52b   : > { %1486 = vrot.lane.b32.xlu0 %v1148_v10, %s3101_s20 }
 0x59e   : > { %v1330_v44 = vpop.xlane.xlu0 %1329 }
 0x59f   : > { %2993 = vrcp.f32 %v1330_v44 }
 0x5a2   : > { %v1333_v46 = vpop.xlane.xlu1 %1332  ;;  %v1487_v54 = vpop.permute.xlu0 %1486 }
 0x5a3   : > { %2995 = vrcp.f32 %v1333_v46 }
 0x5a6   : > { %v1563_v47 = vpop.permute.xlu1 %1562 }
 0x5a7   : > { %2868 = vmatmul.mubr.msk.f32.vlgmr.msra.gmra.mxu0 %vm1163_vm3, %v1563_v47 }
 0x5a8   : > { %2877 = vmatprep.mubr.msk.f32.mxu0 %vm3098_vm2, %v3097_v3 }
 0x5ac   : > { %v2994_v49 = vpop.eup %2993 }
 0x5ad   : > { %v1336_v50 = vmul.f32 %v2994_v49, %v2990_v39 }
 0x5af   : > { %2853 = vmatmul.mubr.msk.f32.vlgmr.msra.gmra.mxu1 %vm1315_vm5, %v1336_v50 }
 0x5b0   : > { %v2996_v52 = vpop.eup %2995  ;;  %2856 = vmatpush3.msra.mxu1 %v1154_v51  ;;  %2857 = vmatprep.mubr.msk.f32.mxu1 %vm3098_vm2, %v3097_v3 }
 0x5b1   : > { %2860 = vmatprep.subr.mxu1 %v3097_v3  ;;  %v1337_v53 = vmul.f32 %v2996_v52, %v2992_v41 }
 0x5b3   : > { %2858 = vmatmul.mubr.msk.f32.vlgmr.msra.gmra.mxu1 %vm1315_vm5, %v1337_v53 }
 0x5b4   : > { %2861 = vmatpush3.xpose.msk.msra.mxu1 %vm1163_vm3, %v1487_v54  ;;  %2862 = vmatprep.mubr.msk.f32.mxu1 %vm3098_vm2, %v3097_v3 }
 0x5b5   : > { %2870 = vmatprep.subr.mxu1 %v3097_v3 }
 0x5b7   : > { %2863 = vmatmul.mubr.msk.f32.vlgmr.msra.gmra.mxu1 %vm1163_vm3, %v1485_v43 }
 0x5b8   : > { %2872 = vmatprep.mubr.msk.f32.mxu1 %vm3098_vm2, %v3097_v3 }
 0x667   : > { %v1636_v55 = vpop.f32.mrf.mxu0 }
 0x668   : > { %v1637_v56 = vadd.f32 %v1636_v55, %v3409_v21 }
 0x669   : > { %v2869_v57 = vpop.f32.mrf.mxu0 }
 0x66a   : > { %v1643_v58 = vsel %vm1315_vm5, %v1637_v56, -inf }
 0x66b   : > { %1644 = vmax.xlane.f32.xlu1 %v1643_v58 }
 0x66f   : > { %v3440_v59 = vpop.f32.mrf.mxu1 }
 0x671   : > { %v2854_v60 = vpop.f32.mrf.mxu1 }
 0x672   : > { %v2959_v60 = vld [vmem:[%s3272_s15 + $0x34] ss:$8 sps:$4 sm:$0xff]  }
 0x673   : > { %v1480_v61 = vpop.f32.mrf.mxu1 }
 0x675   : > { %v2859_v62 = vpop.f32.mrf.mxu1 }
 0x676   : > { %v2962_v62 = vld [vmem:[%s3272_s15 + $0x24] ss:$8 sps:$4 sm:$0xff]  }
 0x677   : > { %v1558_v63 = vpop.f32.mrf.mxu1 }
 0x678   : > { %v1559_v0 = vadd.f32 %v1558_v63, %v3409_v21  ;;  %v2960_v63 = vld [vmem:[%s3272_s15 + $0x20] ss:$8 sps:$4 sm:$0xff]  }
 0x679   : > { %v2864_v1 = vpop.f32.mrf.mxu1 }
 0x67a   : > { %v1640_v2 = vsel %vm1315_vm5, %v1559_v0, -inf  ;;  %v2963_v1 = vld [vmem:[%s3272_s15 + $0x10] ss:$8 sps:$4 sm:$0xff]  }
 0x67b   : > { %1641 = vmax.xlane.f32.xlu0 %v1640_v2  ;;  %v2968_v2 = vld [vmem:[%s3272_s15 + $0x4] ss:$8 sps:$4 sm:$0xff]  }
 0x67c   : > { %1740 = vrot.lane.b32.xlu1 %v1154_v51, %s3102_s0 }
 0x6f4   : > { %v1645_v4 = vpop.xlane.xlu1 %1644 }
 0x6f5   : > { %v1647_v7 = vsub.f32 %v1637_v56, %v1645_v4  ;;  %v2966_v4 = vld [vmem:[%s3272_s15] ss:$8 sps:$4 sm:$0xff]  }
 0x6f7   : > { %v1650_v8 = vmul.f32 1.442695, %v1647_v7 }
 0x6f8   : > { %v1741_v9 = vpop.permute.xlu1 %1740 }
 0x6f9   : > { %2997 = vpow2.f32 %v1650_v8  ;;  %2876 = vmatpush3.msra.mxu0 %v1741_v9 }
 0x6fa   : > { %2880 = vmatprep.subr.bf16.mxu0 %v3097_v3 }
 0x704   : > { %v1642_v10 = vpop.xlane.xlu0 %1641 }
 0x705   : > { %v1646_v11 = vsub.f32 %v1559_v0, %v1642_v10  ;;  %v2965_v0 = vld [vmem:[%s3272_s15 + $0x14] ss:$8 sps:$4 sm:$0xff]  }
 0x706   : > { %v2998_v12 = vpop.eup %2997 }
 0x707   : > { %v1648_v13 = vmul.f32 1.442695, %v1646_v11  ;;  %v1655_v15 = vsel %vm1315_vm5, %v2998_v12, 0.0 }
 0x708   : > { %1656 = vadd.xlane.f32.xlu0 %v1655_v15 }
 0x709   : > { %2999 = vpow2.f32 %v1648_v13 }
 0x716   : > { %v3000_v16 = vpop.eup %2999 }
 0x717   : > { %v1652_v17 = vsel %vm1315_vm5, %v3000_v16, 0.0 }
 0x718   : > { %1653 = vadd.xlane.f32.xlu0 %v1652_v17 }
 0x72e   : > { %1663 = vrot.lane.b32.xlu0 %v3402_v18, %s3102_s0  ;;  %v2953_v18 = vld [vmem:[%s3259_s4 + $0x18] sm:$0xff]  }
 0x791   : > { %v1657_v19 = vpop.xlane.xlu0 %1656 }
 0x792   : > { %3001 = vrcp.f32 %v1657_v19 }
 0x79f   : > { %v3002_v20 = vpop.eup %3001 }
 0x7a0   : > { %v1661_v21 = vmul.f32 %v3002_v20, %v2998_v12 }
 0x7a1   : > { %v1654_v22 = vpop.xlane.xlu0 %1653 }
 0x7a2   : > { %3003 = vrcp.f32 %v1654_v22  ;;  %2878 = vmatmul.mubr.msk.f32.vlgmr.msra.gmra.mxu0 %vm1315_vm5, %v1661_v21  ;;  %v2745_v21 = vld [vmem:[%s3651_s27] ss:$0 sm:$0xff] }
 0x7a3   : > { %2888 = vmatprep.mubr.msk.bf16.mxu0 %vm3098_vm2, %v3097_v3  ;;  %2881 = vmatpush3.bf16.msra.mxu0 %v2953_v18  ;;  %v2969_v18 = vld [vmem:[%s3283_s5 + $0x78] sm:$0xff]  }
 0x7a4   : > { %2882 = vmatprep.subr.bf16.mxu0 %v3097_v3 }
 0x7a5   : > { %v1664_v23 = vpop.permute.xlu0 %1663 }
 0x7a6   : > { %2871 = vmatpush3.msra.mxu1 %v1664_v23 }
 0x7a7   : > { %2883 = vmatpush3.bf16.msra.mxu0 %v2954_v26  ;;  %v2970_v26 = vld [vmem:[%s3283_s5 + $0x38] sm:$0xff]   ;;  %2813 = vmatprep.subr.bf16.mxu1 %v2969_v18 }
 0x7a8   : > { %2884 = vmatprep.subr.bf16.mxu0 %v3097_v3 }
 0x7ab   : > { %2885 = vmatpush3.bf16.msra.mxu0 %v2955_v29  ;;  %v2971_v29 = vld [vmem:[%s3283_s5 + $0x70] sm:$0xff]  }
 0x7ac   : > { %2886 = vmatprep.subr.bf16.mxu0 %v3097_v3  ;;  %v2738_v3 = vld [vmem:[%s3649_s3] ss:$0 sm:$0xff] }
 0x7af   : > { %v3004_v24 = vpop.eup %3003  ;;  %2887 = vmatpush3.bf16.msra.mxu0 %v2956_v32  ;;  %v2974_v32 = vld [vmem:[%s3283_s5 + $0x28] sm:$0xff]  }
 0x7b0   : > { %v1660_v25 = vmul.f32 %v3004_v24, %v3000_v16  ;;  %2028 = vmatprep.subr.bf16.mxu0 %v2959_v60 }
 0x7b2   : > { %2873 = vmatmul.mubr.msk.f32.vlgmr.msra.gmra.mxu1 %vm1315_vm5, %v1660_v25 }
 0x7b3   : > { %2814 = vmatpush3.bf16.msra.mxu1 %v2970_v26 }
 0x7b4   : > { %2815 = vmatprep.subr.bf16.mxu1 %v2971_v29 }
 0x862   : > { %v1812_v30 = vpop.f32.mrf.mxu0 }
 0x864   : > { %v2879_v31 = vpop.f32.mrf.mxu0 }
 0x865   : > { %v2973_v31 = vld [vmem:[%s3283_s5 + $0x68] sm:$0xff]  }
 0x872   : > { %v1735_v33 = vpop.f32.mrf.mxu1 }
 0x873   : > { %v2936_v34 = vpack.i.bf16 %v1812_v30, %v1735_v33  ;;  %v2972_v30 = vld [vmem:[%s3283_s5 + $0x30] sm:$0xff]   ;;  %v2975_v33 = vld [vmem:[%s3283_s5 + $0x60] sm:$0xff]  }
 0x874   : > { %v2874_v35 = vpop.f32.mrf.mxu1  ;;  %2816 = vmatpush3.bf16.msra.mxu1 %v2972_v30 }
 0x875   : > { %2937 = vrot.lane.b32.xlu1 %v2936_v34, %s3101_s20  ;;  %2817 = vmatprep.subr.bf16.mxu1 %v2973_v31  ;;  %v2976_v34 = vld [vmem:[%s3283_s5 + $0x20] sm:$0xff]   ;;  %v2977_v35 = vld [vmem:[%s3283_s5 + $0x58] sm:$0xff]  }
 0x878   : > { %2818 = vmatpush3.bf16.msra.mxu1 %v2974_v32  ;;  %v2755_v32 = vld [vmem:[%s3652_s18] ss:$0 sm:$0xff] }
 0x879   : > { %2819 = vmatprep.subr.bf16.mxu1 %v2975_v33 }
 0x87c   : > { %2820 = vmatpush3.bf16.msra.mxu1 %v2976_v34 }
 0x87d   : > { %2821 = vmatprep.subr.bf16.mxu1 %v2977_v35 }
 0x8e7   : > { %v2938_v36 = vpop.permute.xlu1 %2937 }
 0x8e8   : > { %v2940_v37 = vunpack.i.h.bf16 %v2938_v36  ;;  %v2939_v38 = vunpack.i.l.bf16 %v2938_v36  ;;  %v2978_v36 = vld [vmem:[%s3283_s5 + $0x18] sm:$0xff]  }
 0x8e9   : > { %2822 = vmatpush3.bf16.msra.mxu1 %v2978_v36 }
 0x8ea   : > { %v1825_v39 = vsel %vm1163_vm3, %v1480_v61, %v2940_v37  ;;  %v1824_v40 = vsel %vm1163_vm3, %v3440_v59, %v2939_v38  ;;  %v2957_v61 = vld [vmem:[%s3272_s15 + $0x30] ss:$8 sps:$4 sm:$0xff]   ;;  %s3650_s15 = scalar_lea.vmem %s3607_s9, %s3229_s26 }
 0x8eb   : > { %v1826_v41 = vpack.c.bf16 %v1825_v39, %v1824_v40  ;;  %v2744_v16 = vld [vmem:[%s3650_s15] ss:$0 sm:$0xff]  ;;  %v2979_v37 = vld [vmem:[%s3283_s5 + $0x50] sm:$0xff]   ;;  %v2981_v39 = vld [vmem:[%s3283_s5 + $0x48] sm:$0xff]  }
 0x8ec   : > { %v2980_v38 = vld [vmem:[%s3283_s5 + $0x10] sm:$0xff]   ;;  %2823 = vmatprep.subr.bf16.mxu1 %v2979_v37  ;;  %v2982_v40 = vld [vmem:[%s3283_s5 + $0x8] sm:$0xff]  }
 0x8ed   : > { %2889 = vmatmul.mubr.msk.bf16.vlgmr.msra.gmra.mxu0 %vm1003_vm1, %v1826_v41  ;;  %2824 = vmatpush3.bf16.msra.mxu1 %v2980_v38  ;;  %v2983_v41 = vld [vmem:[%s3283_s5 + $0x40] sm:$0xff]  }
 0x8ee   : > { %2052 = vmatprep.mubr.bf16.mxu0 %v3096_v45  ;;  %2029 = vmatpush1.bf16.msra.mxu0 %v2957_v61 }
 0x8ef   : > { %2030 = vmatprep.subr.bf16.mxu0 %v2962_v62  ;;  %2825 = vmatprep.subr.bf16.mxu1 %v2981_v39 }
 0x8f1   : > { %2826 = vmatpush3.bf16.msra.mxu1 %v2982_v40 }
 0x8f2   : > { %2031 = vmatpush1.bf16.msra.mxu0 %v2960_v63  ;;  %2827 = vmatprep.subr.bf16.mxu1 %v2983_v41 }
 0x8f3   : > { %2032 = vmatprep.subr.bf16.mxu0 %v2965_v0 }
 0x8f6   : > { %2033 = vmatpush1.bf16.msra.mxu0 %v2963_v1 }
 0x8f7   : > { %2034 = vmatprep.subr.bf16.mxu0 %v2968_v2 }
 0x8fa   : > { %2035 = vmatpush1.bf16.msra.mxu0 %v2966_v4 }
 0x9ad   : > { %v1903_v42 = vpop.f32.mrf.mxu0 }
 0x9ae   : > { %v1904_v43 = vadd.f32 %v2738_v3, %v1903_v42  ;;  %v1965_v42 = vld [vmem:[%s3277_s28] sm:$0x3] }
 0x9af   : > { %v2890_v44 = vpop.f32.mrf.mxu0 }
 0x9b0   : > { %v3473_v46 = vadd.f32 %v1904_v43, %v3347_v27  ;;  %v1970_v43 = vrot.slane %v1965_v42, %v3388_v6  ;;  %v1974_v44 = vrot.slane %v1965_v42, %v1066_v14 }
 0x9b1   : > { %v1906_v47 = vpop.f32.mrf.mxu0 }
 0x9b2   : > { %v1907_v48 = vadd.f32 %v2738_v3, %v1906_v47  ;;  %v1912_v49 = vsel %vm1003_vm1, %v3473_v46, 0.0  ;;  %v2984_v3 = vld [vmem:[%s3283_s5] sm:$0xff]   ;;  %s3655_s5 = sld [smem:[#allocation29_spill]] (!%p2772_p5) }
 0x9b3   : > { %1913 = vadd.xlane.f32.xlu1 %v1912_v49  ;;  %v2891_v50 = vpop.f32.mrf.mxu0  ;;  %2828 = vmatpush3.bf16.msra.mxu1 %v2984_v3 }
 0x9b4   : > { %v3478_v45 = vadd.f32 %v1907_v48, %v3349_v28 }
 0x9b6   : > { %v1915_v51 = vsel %vm1003_vm1, %v3478_v45, 0.0 }
 0x9b7   : > { %1916 = vadd.xlane.f32.xlu0 %v1915_v51 }
 0xa3c   : > { %v1914_v52 = vpop.xlane.xlu1 %1913 }
 0xa3d   : > { %v1918_v27 = vmul.f32 0.015625, %v1914_v52 }
 0xa3f   : > { %v1920_v53 = vsub.f32 %v3473_v46, %v1918_v27 }
 0xa40   : > { %v1917_v54 = vpop.xlane.xlu0 %1916 }
 0xa41   : > { %v1919_v55 = vmul.f32 0.015625, %v1917_v54  ;;  %v1922_v56 = vmul.f32 %v1920_v53, %v1920_v53 }
 0xa43   : > { %v1921_v57 = vsub.f32 %v3478_v45, %v1919_v55  ;;  %v1924_v28 = vsel %vm1003_vm1, %v1922_v56, 0.0 }
 0xa44   : > { %1925 = vadd.xlane.f32.xlu0 %v1924_v28 }
 0xa45   : > { %v1923_v58 = vmul.f32 %v1921_v57, %v1921_v57 }
 0xa47   : > { %v1927_v59 = vsel %vm1003_vm1, %v1923_v58, 0.0 }
 0xa48   : > { %1928 = vadd.xlane.f32.xlu0 %v1927_v59 }
 0xacd   : > { %v1926_v7 = vpop.xlane.xlu0 %1925 }
 0xace   : > { %v1930_v8 = vmul.f32 0.015625, %v1926_v7 }
 0xad0   : > { %v1932_v9 = vadd.f32 1e-06, %v1930_v8 }
 0xad1   : > { %v1929_v10 = vpop.xlane.xlu0 %1928 }
 0xad2   : > { %3005 = vrsqrt.f32 %v1932_v9  ;;  %v1931_v11 = vmul.f32 0.015625, %v1929_v10 }
 0xad4   : > { %v1933_v12 = vadd.f32 1e-06, %v1931_v11 }
 0xad6   : > { %3007 = vrsqrt.f32 %v1933_v12 }
 0xadf   : > { %v3006_v13 = vpop.eup %3005 }
 0xae0   : > { %v1936_v15 = vmul.f32 %v3006_v13, %v1920_v53 }
 0xae2   : > { %v1945_v20 = vmul.f32 %v2744_v16, %v1936_v15 }
 0xae3   : > { %v3008_v17 = vpop.eup %3007 }
 0xae4   : > { %v1937_v19 = vmul.f32 %v3008_v17, %v1921_v57  ;;  %v1954_v23 = vadd.f32 %v2745_v21, %v1945_v20 }
 0xae6   : > { %v1946_v22 = vmul.f32 %v2744_v16, %v1937_v19 }
 0xae8   : > { %v1955_v24 = vadd.f32 %v2745_v21, %v1946_v22 }
 0xaea   : > { %v1956_v25 = vpack.c.bf16 %v1955_v24, %v1954_v23 }
 0xaec   : > { %2754 = vmatmul.mubr.msk.bf16.vlgmr.msra.gmra.mxu0 %vm1003_vm1, %v1956_v25 }
 0xbac   : > { %v2054_v47 = vpop.f32.mrf.mxu0 }
 0xbad   : > { %v2055_v48 = vadd.f32 %v2054_v47, %v1970_v43 }
 0xbae   : > { %v2056_v49 = vpop.f32.mrf.mxu0 }
 0xbaf   : > { %v2063_v50 = vmul.f32 %v2055_v48, %v2055_v48  ;;  %v2057_v51 = vadd.f32 %v2056_v49, %v1974_v44 }
 0xbb0   : > { %v2058_v52 = vpop.f32.mrf.mxu0 }
 0xbb1   : > { %v2067_v27 = vmul.f32 %v2063_v50, %v2055_v48  ;;  %v2064_v53 = vmul.f32 %v2057_v51, %v2057_v51  ;;  %v2059_v54 = vadd.f32 %v2058_v52, %v1970_v43 }
 0xbb2   : > { %v2060_v55 = vpop.f32.mrf.mxu0 }
 0xbb3   : > { %v2071_v56 = vmul.f32 0.044715, %v2067_v27  ;;  %v2068_v57 = vmul.f32 %v2064_v53, %v2057_v51  ;;  %v2065_v28 = vmul.f32 %v2059_v54, %v2059_v54  ;;  %v2061_v58 = vadd.f32 %v2060_v55, %v1974_v44 }
 0xbb5   : > { %v2075_v59 = vadd.f32 %v2071_v56, %v2055_v48  ;;  %v2072_v60 = vmul.f32 0.044715, %v2068_v57  ;;  %v2069_v61 = vmul.f32 %v2065_v28, %v2059_v54  ;;  %v2066_v62 = vmul.f32 %v2061_v58, %v2061_v58 }
 0xbb7   : > { %v2079_v5 = vmul.f32 0.7978846, %v2075_v59  ;;  %v2076_v14 = vadd.f32 %v2072_v60, %v2057_v51  ;;  %v2073_v63 = vmul.f32 0.044715, %v2069_v61  ;;  %v2070_v0 = vmul.f32 %v2066_v62, %v2061_v58 }
 0xbb9   : > { %v2080_v1 = vmul.f32 0.7978846, %v2076_v14  ;;  %v2077_v2 = vadd.f32 %v2073_v63, %v2059_v54  ;;  %v2074_v4 = vmul.f32 0.044715, %v2070_v0  ;;  %3009 = vtanh.f32 %v2079_v5 }
 0xbbb   : > { %3011 = vtanh.f32 %v2080_v1  ;;  %v2081_v7 = vmul.f32 0.7978846, %v2077_v2  ;;  %v2078_v8 = vadd.f32 %v2074_v4, %v2061_v58 }
 0xbbd   : > { %3013 = vtanh.f32 %v2081_v7  ;;  %v2082_v9 = vmul.f32 0.7978846, %v2078_v8 }
 0xbbf   : > { %3015 = vtanh.f32 %v2082_v9 }
 0xbc6   : > { %v3010_v10 = vpop.eup %3009 }
 0xbc7   : > { %v2087_v15 = vadd.f32 1.0, %v3010_v10 }
 0xbc8   : > { %v3012_v11 = vpop.eup %3011 }
 0xbc9   : > { %v2088_v12 = vadd.f32 1.0, %v3012_v11  ;;  %v2091_v22 = vmul.f32 0.5, %v2087_v15 }
 0xbca   : > { %v3014_v13 = vpop.eup %3013 }
 0xbcb   : > { %v2089_v16 = vadd.f32 1.0, %v3014_v13  ;;  %v2092_v21 = vmul.f32 0.5, %v2088_v12  ;;  %v2095_v26 = vmul.f32 %v2091_v22, %v2055_v48 }
 0xbcc   : > { %v3016_v17 = vpop.eup %3015 }
 0xbcd   : > { %v2093_v19 = vmul.f32 0.5, %v2089_v16  ;;  %v2090_v20 = vadd.f32 1.0, %v3016_v17  ;;  %v2096_v25 = vmul.f32 %v2092_v21, %v2057_v51 }
 0xbcf   : > { %v2094_v23 = vmul.f32 0.5, %v2090_v20  ;;  %v2097_v24 = vmul.f32 %v2093_v19, %v2059_v54 }
 0xbd1   : > { %v2098_v18 = vmul.f32 %v2094_v23, %v2061_v58  ;;  %v2099_v30 = vpack.c.bf16 %v2097_v24, %v2095_v26 }
 0xbd3   : > { %v2100_v29 = vpack.c.bf16 %v2098_v18, %v2096_v25 }
 0xbd5   : > { %2268 = vmatprep.mubr.bf16.mxu1 %v2100_v29 }
 0xbd6   : > { %2269 = vmatmul.mubr.bf16.vlgmr.msra.gmra.mxu1 %v2099_v30 }
 0xc96   : > { %v2829_v31 = vpop.f32.mrf.mxu1 }
 0xc98   : > { %v2830_v33 = vpop.f32.mrf.mxu1 }
 0xc99   : > { %v2831_v34 = vadd.f32 %v2830_v33, %v2829_v31 }
 0xc9a   : > { %v2832_v35 = vpop.f32.mrf.mxu1 }
 0xc9b   : > { %v2271_v36 = vadd.f32 %v2831_v34, %v2755_v32 }
 0xc9c   : > { %v2833_v37 = vpop.f32.mrf.mxu1 }
 0xc9d   : > { %v2277_v38 = vadd.f32 %v2271_v36, %v3473_v46  ;;  %v2834_v39 = vadd.f32 %v2833_v37, %v2832_v35 }
 0xc9f   : > { %2279 = vst.msk [vmem:[#allocation2] sm:$0xff] %vm1003_vm1, %v2277_v38  ;;  %v2274_v40 = vadd.f32 %v2834_v39, %v2755_v32  ;;  %2284 = sbr.rel (%p2772_p5) target bundleno = 3828 (0xef4), region = 202 }
 0xca1   : > { %v2278_v41 = vadd.f32 %v2274_v40, %v3478_v45 }
 0xca3   : > { %2280 = vst.msk [vmem:[#allocation2 + $0x8] sm:$0xff] %vm1003_vm1, %v2278_v41 }
 0xca4   : > { %v2287_v3 = vrot.slane %v2278_v41, 7  ;;  %vm2288_vm6 = vcmask 1041409   ;;  %vm2291_vm7 = vcmask 517120   ;;  %v3017_v53 = vld [vmem:[%s3617_s19 + $0x18] sm:$0xff]   ;;  %v3103_v54 = vmov 0.0   ;;  %v3018_v55 = vld [vmem:[%s3617_s19 + $0x10] sm:$0xff]  }
 0xca5   : > { %2892 = vmatprep.subr.bf16.mxu0 %v3103_v54  ;;  %vm3104_vm8 = vmmov 0   ;;  %v3019_v56 = vld [vmem:[%s3617_s19 + $0x8] sm:$0xff]   ;;  %v3020_v57 = vld [vmem:[%s3617_s19] sm:$0xff]   ;;  %vm2485_vm9 = vcmask 123904  }
 0xca6   : > { %v2289_v42 = vsel %vm2288_vm6, %v2287_v3, %v2277_v38  ;;  %2900 = vmatprep.mubr.msk.bf16.mxu0 %vm3104_vm8, %v3103_v54  ;;  %2893 = vmatpush3.bf16.msra.mxu0 %v3017_v53  ;;  %v2773_v5 = vld [vmem:[%s3653_s16] ss:$0 sm:$0xff] }
 0xca7   : > { %v2292_v43 = vsel %vm2291_vm7, %v2289_v42, 0.0  ;;  %2894 = vmatprep.subr.bf16.mxu0 %v3103_v54  ;;  %v2774_v1 = vld [vmem:[%s3654_s2] ss:$0 sm:$0xff] }
 0xca8   : > { %2293 = vadd.xlane.f32.xlu0 %v2292_v43 }
 0xcaa   : > { %2895 = vmatpush3.bf16.msra.mxu0 %v3018_v55 }
 0xcab   : > { %2896 = vmatprep.subr.bf16.mxu0 %v3103_v54 }
 0xcae   : > { %2897 = vmatpush3.bf16.msra.mxu0 %v3019_v56 }
 0xcaf   : > { %2898 = vmatprep.subr.bf16.mxu0 %v3103_v54 }
 0xcb2   : > { %2899 = vmatpush3.bf16.msra.mxu0 %v3020_v57 }
 0xd31   : > { %v2294_v46 = vpop.xlane.xlu0 %2293 }
 0xd32   : > { %v2295_v44 = vmul.f32 0.015625, %v2294_v46 }
 0xd34   : > { %v2297_v47 = vrot.slane %v2295_v44, 1  ;;  %v2300_v48 = vsub.f32 %v2277_v38, %v2295_v44  ;;  %v2775_v38 = vld [vmem:[%s3655_s5] ss:$0 sm:$0xff] }
 0xd36   : > { %v2301_v49 = vsub.f32 %v2278_v41, %v2297_v47  ;;  %v2302_v45 = vmul.f32 %v2300_v48, %v2300_v48  ;;  %v2776_v41 = vld [vmem:[%s3656_s21] ss:$0 sm:$0xff] }
 0xd38   : > { %v2303_v50 = vmul.f32 %v2301_v49, %v2301_v49 }
 0xd3a   : > { %v2306_v51 = vrot.slane %v2303_v50, 7 }
 0xd3c   : > { %v2307_v52 = vsel %vm2288_vm6, %v2306_v51, %v2302_v45 }
 0xd3d   : > { %v2309_v27 = vsel %vm2291_vm7, %v2307_v52, 0.0 }
 0xd3e   : > { %2310 = vadd.xlane.f32.xlu0 %v2309_v27 }
 0xdc7   : > { %v2311_v28 = vpop.xlane.xlu0 %2310 }
 0xdc8   : > { %v2312_v58 = vmul.f32 0.015625, %v2311_v28 }
 0xdca   : > { %v2313_v59 = vadd.f32 1e-06, %v2312_v58 }
 0xdcc   : > { %3021 = vrsqrt.f32 %v2313_v59 }
 0xdd9   : > { %v3022_v60 = vpop.eup %3021 }
 0xdda   : > { %v2316_v61 = vrot.slane %v3022_v60, 1  ;;  %v2319_v62 = vmul.f32 %v3022_v60, %v2300_v48 }
 0xddc   : > { %v2320_v14 = vmul.f32 %v2316_v61, %v2301_v49  ;;  %v2328_v63 = vmul.f32 %v2773_v5, %v2319_v62 }
 0xdde   : > { %v2329_v0 = vmul.f32 %v2773_v5, %v2320_v14  ;;  %v2337_v4 = vadd.f32 %v2774_v1, %v2328_v63 }
 0xde0   : > { %v2338_v2 = vadd.f32 %v2774_v1, %v2329_v0 }
 0xde2   : > { %v2341_v7 = vrot.slane %v2338_v2, 7 }
 0xde4   : > { %v2342_v8 = vsel %vm2288_vm6, %v2341_v7, %v2337_v4 }
 0xde5   : > { %2344 = vst.msk [vmem:[#allocation3] sm:$0x3] %vm2291_vm7, %v2342_v8  ;;  %v2345_v9 = vsel %vm2291_vm7, %v2342_v8, 0.0 }
 0xde6   : > { %v2346_v10 = vrot.slane %v2345_v9, 4 }
 0xde8   : > { %v2347_v11 = vadd.f32 %v2346_v10, %v2345_v9 }
 0xdea   : > { %v2348_v12 = vrot.slane %v2347_v11, 2 }
 0xdec   : > { %v2349_v13 = vadd.f32 %v2348_v12, %v2347_v11 }
 0xdee   : > { %v2350_v15 = vrot.slane %v2349_v13, 1 }
 0xdf0   : > { %v2351_v16 = vadd.f32 %v2350_v15, %v2349_v13 }
 0xdf2   : > { %v2353_v17 = vmul.f32 0.5, %v2351_v16 }
 0xdf4   : > { %v2357_v19 = vrot.slane %v2353_v17, %v3388_v6 }
 0xdf6   : > { %v2358_v20 = vsub.f32 %v2337_v4, %v2357_v19  ;;  %v2359_v21 = vsub.f32 %v2338_v2, %v2357_v19 }
 0xdf8   : > { %v2361_v22 = vmul.f32 %v2359_v21, %v2359_v21  ;;  %v2360_v23 = vmul.f32 %v2358_v20, %v2358_v20 }
 0xdfa   : > { %v2364_v24 = vrot.slane %v2361_v22, 7 }
 0xdfc   : > { %v2365_v25 = vsel %vm2288_vm6, %v2364_v24, %v2360_v23 }
 0xdfd   : > { %v2367_v18 = vsel %vm2291_vm7, %v2365_v25, 0.0 }
 0xdfe   : > { %v2368_v26 = vrot.slane %v2367_v18, 4 }
 0xe00   : > { %v2369_v29 = vadd.f32 %v2368_v26, %v2367_v18 }
 0xe02   : > { %v2370_v30 = vrot.slane %v2369_v29, 2 }
 0xe04   : > { %v2371_v31 = vadd.f32 %v2370_v30, %v2369_v29 }
 0xe06   : > { %v2372_v32 = vrot.slane %v2371_v31, 1 }
 0xe08   : > { %v2373_v33 = vadd.f32 %v2372_v32, %v2371_v31 }
 0xe0a   : > { %v2374_v34 = vmul.f32 0.5, %v2373_v33 }
 0xe0c   : > { %v2375_v35 = vadd.f32 1e-05, %v2374_v34 }
 0xe0e   : > { %3023 = vrsqrt.f32 %v2375_v35 }
 0xe1b   : > { %v3024_v36 = vpop.eup %3023 }
 0xe1c   : > { %v2380_v37 = vrot.slane %v3024_v36, %v3388_v6 }
 0xe1e   : > { %v2381_v39 = vmul.f32 %v2380_v37, %v2358_v20  ;;  %v2382_v40 = vmul.f32 %v2380_v37, %v2359_v21 }
 0xe20   : > { %v2390_v3 = vmul.f32 %v2775_v38, %v2381_v39  ;;  %v2391_v42 = vmul.f32 %v2775_v38, %v2382_v40 }
 0xe22   : > { %v2399_v43 = vadd.f32 %v2776_v41, %v2390_v3  ;;  %v2400_v46 = vadd.f32 %v2776_v41, %v2391_v42 }
 0xe24   : > { %v2401_v44 = vpack.c.bf16 %v2399_v43, %v2399_v43  ;;  %v2402_v47 = vpack.c.bf16 %v2400_v46, %v2400_v46 }
 0xe26   : > { %v2414_v48 = vunpack.c.l.b16 %v2402_v47  ;;  %v2413_v49 = vunpack.c.l.b16 %v2401_v44 }
 0xe28   : > { %v2415_v50 = vrot.slane %v2414_v48, 7 }
 0xe2a   : > { %v2416_v6 = vsel %vm2288_vm6, %v2415_v50, %v2413_v49 }
 0xe2b   : > { %v2417_v45 = vpack.c.b16 %v2416_v6, %v2416_v6 }
 0xe2d   : > { %2901 = vmatmul.mubr.msk.bf16.vlgmr.msra.gmra.mxu0 %vm1003_vm1, %v2417_v45 }
 0xeed   : > { %v2479_v51 = vpop.f32.mrf.mxu0 }
 0xeee   : > { %2486 = vst.msk [vmem:[#allocation5] sm:$0x3] %vm2485_vm9, %v2479_v51 }
 0xeef   : > { %v2902_v52 = vpop.f32.mrf.mxu0 }
 0xef1   : > { %v2482_v27 = vpop.f32.mrf.mxu0 }
 0xef3   : > { %v2903_v53 = vpop.f32.mrf.mxu0 }
 0xef4 PF: > { %p2912_p6 = scmp.eq.s32.totalorder %s3223_s25, 1  ;;  %s3105_s1 = smov [#allocation3]  }
 0xef5   : > { %s2494_s29 = sshll.u32 %s3105_s1, 4  ;;  %s3106_s20 = smov [#allocation5]   ;;  %s2495_s29 = int_to_ptr.vmem [resolvable:$true] %s2494_s29 }
 0xef6   : > { %s2505_s0 = sshll.u32 %s3106_s20, 4  ;;  %s3025_s4 = scalar_lea.vmem %s2495_s29, 32  ;;  %s2506_s0 = int_to_ptr.vmem [resolvable:$true] %s2505_s0 }
 0xef7   : > { %p3026_p7 = scmp.ne.s32.totalorder %s2495_s29, %s3025_s4  ;;  %p3032_p10 = scmp.lt.s32.totalorder %s2495_s29, %s2495_s29 }
 0xef8   : > { %p3033_p11 = scmp.lt.s32.totalorder %s3025_s4, %s3025_s4 }
 0xef9   : > { %p3027_p8 = pnand %p3026_p7, %p2912_p6 }
 0xefa   : > { %p3034_p12 = por %p3033_p11, %p3032_p10 }
 0xefb   : > { %p3028_p9 = pneg %p3027_p8 }
 0xefd   : > { %p3035_p13 = pnand %p3034_p12, %p3028_p9 }
 0xeff   : > { %3038 = shalt.err (!%p3035_p13)
}
 0xf00   : > { %s3657_s23 = sld [smem:[#allocation31_spill]]  ;;  %s3049_s16 = scalar_lea.vmem %s2506_s0, 32 }
 0xf01   : > { %p3050_p0 = scmp.ne.s32.totalorder %s2506_s0, %s3049_s16  ;;  %p3056_p3 = scmp.lt.s32.totalorder %s2506_s0, %s2506_s0 }
 0xf02   : > { %p3057_p4 = scmp.lt.s32.totalorder %s3049_s16, %s3049_s16 }
 0xf03   : > { %p3051_p1 = pnand %p3050_p0, %p2912_p6 }
 0xf04   : > { %p3058_p5 = por %p3057_p4, %p3056_p3 }
 0xf05   : > { %p3052_p2 = pneg %p3051_p1 }
 0xf06   : > { %2905 = dma.vmem_to_hbm [thread:$0]  (%p2912_p6), %s2495_s29, 32, %s3657_s23, [#allocation4]  }
 0xf07   : > { %p3059_p7 = pnand %p3058_p5, %p3052_p2 }
 0xf09   : > { %3062 = shalt.err (!%p3059_p7)
}
 0xf0a   : > { %s3658_s2 = sld [smem:[#allocation32_spill]] }
 0xf10   : > { %2907 = dma.vmem_to_hbm [thread:$0]  (%p2912_p6), %s2506_s0, 32, %s3658_s2, [#allocation6]  }
 0xf11   : > { %3084 = dma.done.wait (%p2912_p6), [#allocation4], 32  }
 0xf12   : > { %3086 = vsyncadd (%p2912_p6), [#allocation4], 4294967264 }
 0xf13   : > { %3088 = dma.done.wait (%p2912_p6), [#allocation6], 32  }
 0xf14   : > { %3090 = vsyncadd (%p2912_p6), [#allocation6], 4294967264 }
 0xf15 PF: > { %s3659_s27 = sld [smem:[#allocation19_spill]] }
 0xf1b   : > { %s34_s2 = sadd.s32 1, %s3659_s27  }
 0xf1c   : > { %p31_p8 = scmp.ge.s32.totalorder %s34_s2, 4  }
 0xf1e   :  { %33 = sbr.rel (!%p31_p8) target bundleno = 16 (0x10), region = 302 }
 0xf23   :  { %2522 = vsyncpa [#allocation4], 1 }
 0xf24   :  { %2524 = vsyncpa [#allocation4 + $0x1], 1 }
 0xf25   :  { %2525 = vsyncpa [#allocation6], 1 }

</bundles_post_ra>
